<compile_context>
chip_gen: v7x
topology: tpu7x:2x2x1
jax: 0.10.0
libtpu: 0.0.40
codegen_flags: <defaults>
</compile_context>

<pallas_src>
import jax
import jax.numpy as jnp
from jax.experimental import pallas as pl
from jax.experimental.pallas import tpu as pltpu

IMG_DIM = 28 * 28          # 784
K_PAD = 896                # 7 * 128, padded feature dim
H1, H2, H3, OUT = 128, 256, 128, 1
NEG_SLOPE = 0.1


def _leaky_relu(x, slope=NEG_SLOPE):
    return jnp.where(x > 0, x, slope * x)


def _stable_sigmoid(z):
    # exp() is only ever applied to a non-positive argument -> no inf intermediates.
    ez = jnp.exp(-jnp.abs(z))
    denom = 1.0 + ez
    return jnp.where(z >= 0, 1.0 / denom, ez / denom)


def discriminator_kernel(x_ref,
                         w1_ref, b1_ref,
                         w2_ref, b2_ref,
                         w3_ref, b3_ref,
                         w4_ref, b4_ref,
                         o_ref):
    """Whole MLP on one batch tile: 3 MXU matmuls + VPU/XLU final layer."""
    x = x_ref[...]                                                   # (tile_b, 896) bf16

    # Linear(784 -> 128) + LeakyReLU(0.1)  (bf16 operands, f32 accumulation)
    h = jnp.dot(x, w1_ref[...], preferred_element_type=jnp.float32) + b1_ref[...]
    h = _leaky_relu(h)

    # Linear(128 -> 256) + LeakyReLU(0.1)
    h = jnp.dot(h.astype(jnp.bfloat16), w2_ref[...],
                preferred_element_type=jnp.float32) + b2_ref[...]
    h = _leaky_relu(h)

    # Dropout(0.3): identity in eval/inference mode.
    # TODO(synk): training-mode dropout via pltpu.prng_seed + pltpu.prng_random_bits.

    # Linear(256 -> 128) + LeakyReLU(0.1)
    h = jnp.dot(h.astype(jnp.bfloat16), w3_ref[...],
                preferred_element_type=jnp.float32) + b3_ref[...]
    h = _leaky_relu(h)

    # Linear(128 -> 1) + Sigmoid, computed on VPU (broadcast multiply) + XLU
    # (cross-lane reduce) instead of an N=1 MXU matmul.
    logits = jnp.sum(h * w4_ref[...], axis=-1, keepdims=True) + b4_ref[...]  # (tile_b, 1)
    o_ref[...] = _stable_sigmoid(logits).astype(o_ref.dtype)


def discriminator_forward(x, params, *, tile_b=256):
    """x: (B, IMG_DIM) float32.  params: dict of (in,out) weights + (1,out) biases.

    tile_b should be a multiple of 128 (256+ recommended on v6e/v7x).
    """
    B, D = x.shape
    assert D == IMG_DIM
    assert tile_b % 8 == 0

    num_tiles = pl.cdiv(B, tile_b)
    b_pad = num_tiles * tile_b

    # Pad batch to a tile multiple and feature dim to 896; cast x to bf16.
    x_p = jnp.pad(x.astype(jnp.bfloat16),
                  ((0, b_pad - B), (0, K_PAD - IMG_DIM)))

    # Weights: bf16 for the MXU layers (w1 rows zero-padded to 896); biases f32.
    w1 = jnp.pad(params["w1"].astype(jnp.bfloat16), ((0, K_PAD - IMG_DIM), (0, 0)))
    w2 = params["w2"].astype(jnp.bfloat16)
    w3 = params["w3"].astype(jnp.bfloat16)
    w4_row = params["w4"].reshape(1, H3).astype(jnp.float32)        # (1, 128) for VPU layer
    b1 = params["b1"].astype(jnp.float32)
    b2 = params["b2"].astype(jnp.float32)
    b3 = params["b3"].astype(jnp.float32)
    b4 = params["b4"].reshape(1, 1).astype(jnp.float32)

    def full(a):
        return pl.BlockSpec(a.shape, lambda i: (0,) * a.ndim)

    out = pl.pallas_call(
        discriminator_kernel,
        out_shape=jax.ShapeDtypeStruct((b_pad, OUT), jnp.float32),
        grid_spec=pltpu.PrefetchScalarGridSpec(
            num_scalar_prefetch=0,
            grid=(num_tiles,),
            in_specs=[
                pl.BlockSpec((tile_b, K_PAD), lambda i: (i, 0)),
                full(w1), full(b1),
                full(w2), full(b2),
                full(w3), full(b3),
                full(w4_row), full(b4),
            ],
            out_specs=pl.BlockSpec((tile_b, OUT), lambda i: (i, 0)),
        ),
        compiler_params=pltpu.CompilerParams(
            dimension_semantics=("parallel",),
        ),
    )(x_p, w1, b1, w2, b2, w3, b3, w4_row, b4)

    return out[:B]


def init_params(key):
    """Deterministic init mimicking PyTorch nn.Linear default (U[-1/sqrt(fan_in), +])."""
    def linear(k, fan_in, fan_out):
        kw, kb = jax.random.split(k)
        bound = 1.0 / jnp.sqrt(fan_in)
        w = jax.random.uniform(kw, (fan_in, fan_out), jnp.float32, -bound, bound)
        b = jax.random.uniform(kb, (1, fan_out), jnp.float32, -bound, bound)
        return w, b

    k1, k2, k3, k4 = jax.random.split(key, 4)
    w1, b1 = linear(k1, IMG_DIM, H1)
    w2, b2 = linear(k2, H1, H2)
    w3, b3 = linear(k3, H2, H3)
    w4, b4 = linear(k4, H3, OUT)
    return dict(w1=w1, b1=b1, w2=w2, b2=b2, w3=w3, b3=b3, w4=w4, b4=b4)


def reference_forward(x, p):
    """Pure-JAX reference using the same bf16-operand / f32-accumulate math."""
    def dot_bf16(a, w):
        return jnp.dot(a.astype(jnp.bfloat16), w.astype(jnp.bfloat16),
                       preferred_element_type=jnp.float32)

    h = _leaky_relu(dot_bf16(x, p["w1"]) + p["b1"])
    h = _leaky_relu(dot_bf16(h, p["w2"]) + p["b2"])
    # Dropout(0.3): identity in eval mode.
    h = _leaky_relu(dot_bf16(h, p["w3"]) + p["b3"])
    logits = jnp.dot(h, p["w4"]) + p["b4"]          # final layer in f32, matching the kernel
    return jax.nn.sigmoid(logits)


if __name__ == "__main__":
    key = jax.random.PRNGKey(0)
    kx, kp = jax.random.split(key)

    # Small demo batch; deliberately NOT a tile multiple to exercise padding and a
    # multi-step grid (130 -> padded to 256, grid of 2 at tile_b=128).
    B = 130
    x = jax.random.normal(kx, (B, IMG_DIM), jnp.float32)
    params = init_params(kp)

    out = discriminator_forward(x, params, tile_b=128)
    out = jax.block_until_ready(out)

    ref = reference_forward(x, params)
    assert out.shape == (B, 1), out.shape
    max_err = float(jnp.max(jnp.abs(out - ref)))
    assert max_err < 2e-3, f"mismatch vs pure-JAX reference: max abs err {max_err}"

    print("KERNEL_OK")
</pallas_src>

<mosaic_0001>
module attributes {stable_mosaic.version = 11 : i64} {
  func.func @discriminator_kernel(%arg0: i32, %arg1: memref<128x896xbf16, #tpu.memory_space<vmem>>, %arg2: memref<896x128xbf16, #tpu.memory_space<vmem>>, %arg3: memref<1x128xf32, #tpu.memory_space<vmem>>, %arg4: memref<128x256xbf16, #tpu.memory_space<vmem>>, %arg5: memref<1x256xf32, #tpu.memory_space<vmem>>, %arg6: memref<256x128xbf16, #tpu.memory_space<vmem>>, %arg7: memref<1x128xf32, #tpu.memory_space<vmem>>, %arg8: memref<1x128xf32, #tpu.memory_space<vmem>>, %arg9: memref<1x1xf32, #tpu.memory_space<vmem>>, %arg10: memref<128x1xf32, #tpu.memory_space<vmem>>) attributes {dimension_semantics = [#tpu.dimension_semantics<parallel>], iteration_bounds = array<i64: 2>, scalar_prefetch = 0 : i64, scratch_operands = 0 : i64, tpu.core_type = #tpu.core_type<tc>, window_params = [{transform_indices = @transform_0, window_bounds = array<i64: 128, 896>}, {pipeline_mode = #tpu.pipeline_mode<synchronous>, transform_indices = @transform_1, window_bounds = array<i64: 896, 128>}, {pipeline_mode = #tpu.pipeline_mode<synchronous>, transform_indices = @transform_2, window_bounds = array<i64: 1, 128>}, {pipeline_mode = #tpu.pipeline_mode<synchronous>, transform_indices = @transform_3, window_bounds = array<i64: 128, 256>}, {pipeline_mode = #tpu.pipeline_mode<synchronous>, transform_indices = @transform_4, window_bounds = array<i64: 1, 256>}, {pipeline_mode = #tpu.pipeline_mode<synchronous>, transform_indices = @transform_5, window_bounds = array<i64: 256, 128>}, {pipeline_mode = #tpu.pipeline_mode<synchronous>, transform_indices = @transform_6, window_bounds = array<i64: 1, 128>}, {pipeline_mode = #tpu.pipeline_mode<synchronous>, transform_indices = @transform_7, window_bounds = array<i64: 1, 128>}, {pipeline_mode = #tpu.pipeline_mode<synchronous>, transform_indices = @transform_8, window_bounds = array<i64: 1, 1>}, {transform_indices = @transform_9, window_bounds = array<i64: 128, 1>}]} {
    %c0 = arith.constant 0 : index
    %c0_0 = arith.constant 0 : index
    %0 = vector.load %arg1[%c0, %c0_0] : memref<128x896xbf16, #tpu.memory_space<vmem>>, vector<128x896xbf16>
    %c0_1 = arith.constant 0 : index
    %c0_2 = arith.constant 0 : index
    %1 = vector.load %arg2[%c0_1, %c0_2] : memref<896x128xbf16, #tpu.memory_space<vmem>>, vector<896x128xbf16>
    %cst = arith.constant dense<0.000000e+00> : vector<128x128xf32>
    %2 = tpu.matmul %0, %1, %cst {dimension_numbers = #tpu.dot_dimension_numbers<[1], [0], [0], [1], [0, 0, 1, 1], [], []>} : vector<128x896xbf16>, vector<896x128xbf16>, vector<128x128xf32> -> vector<128x128xf32>
    %c0_3 = arith.constant 0 : index
    %c0_4 = arith.constant 0 : index
    %3 = vector.load %arg3[%c0_3, %c0_4] : memref<1x128xf32, #tpu.memory_space<vmem>>, vector<1x128xf32>
    %4 = vector.broadcast %3 : vector<1x128xf32> to vector<128x128xf32>
    %5 = arith.addf %2, %4 : vector<128x128xf32>
    %cst_5 = arith.constant 0.000000e+00 : f32
    %6 = vector.broadcast %cst_5 : f32 to vector<128x128xf32>
    %7 = arith.cmpf ogt, %5, %6 : vector<128x128xf32>
    %cst_6 = arith.constant 1.000000e-01 : f32
    %8 = vector.broadcast %cst_6 : f32 to vector<128x128xf32>
    %9 = arith.mulf %8, %5 : vector<128x128xf32>
    %10 = arith.select %7, %5, %9 : vector<128x128xi1>, vector<128x128xf32>
    %11 = arith.truncf %10 : vector<128x128xf32> to vector<128x128xbf16>
    %c0_7 = arith.constant 0 : index
    %c0_8 = arith.constant 0 : index
    %12 = vector.load %arg4[%c0_7, %c0_8] : memref<128x256xbf16, #tpu.memory_space<vmem>>, vector<128x256xbf16>
    %cst_9 = arith.constant dense<0.000000e+00> : vector<128x256xf32>
    %13 = tpu.matmul %11, %12, %cst_9 {dimension_numbers = #tpu.dot_dimension_numbers<[1], [0], [0], [1], [0, 0, 1, 1], [], []>} : vector<128x128xbf16>, vector<128x256xbf16>, vector<128x256xf32> -> vector<128x256xf32>
    %c0_10 = arith.constant 0 : index
    %c0_11 = arith.constant 0 : index
    %14 = vector.load %arg5[%c0_10, %c0_11] : memref<1x256xf32, #tpu.memory_space<vmem>>, vector<1x256xf32>
    %15 = vector.broadcast %14 : vector<1x256xf32> to vector<128x256xf32>
    %16 = arith.addf %13, %15 : vector<128x256xf32>
    %cst_12 = arith.constant 0.000000e+00 : f32
    %17 = vector.broadcast %cst_12 : f32 to vector<128x256xf32>
    %18 = arith.cmpf ogt, %16, %17 : vector<128x256xf32>
    %cst_13 = arith.constant 1.000000e-01 : f32
    %19 = vector.broadcast %cst_13 : f32 to vector<128x256xf32>
    %20 = arith.mulf %19, %16 : vector<128x256xf32>
    %21 = arith.select %18, %16, %20 : vector<128x256xi1>, vector<128x256xf32>
    %22 = arith.truncf %21 : vector<128x256xf32> to vector<128x256xbf16>
    %c0_14 = arith.constant 0 : index
    %c0_15 = arith.constant 0 : index
    %23 = vector.load %arg6[%c0_14, %c0_15] : memref<256x128xbf16, #tpu.memory_space<vmem>>, vector<256x128xbf16>
    %cst_16 = arith.constant dense<0.000000e+00> : vector<128x128xf32>
    %24 = tpu.matmul %22, %23, %cst_16 {dimension_numbers = #tpu.dot_dimension_numbers<[1], [0], [0], [1], [0, 0, 1, 1], [], []>} : vector<128x256xbf16>, vector<256x128xbf16>, vector<128x128xf32> -> vector<128x128xf32>
    %c0_17 = arith.constant 0 : index
    %c0_18 = arith.constant 0 : index
    %25 = vector.load %arg7[%c0_17, %c0_18] : memref<1x128xf32, #tpu.memory_space<vmem>>, vector<1x128xf32>
    %26 = vector.broadcast %25 : vector<1x128xf32> to vector<128x128xf32>
    %27 = arith.addf %24, %26 : vector<128x128xf32>
    %cst_19 = arith.constant 0.000000e+00 : f32
    %28 = vector.broadcast %cst_19 : f32 to vector<128x128xf32>
    %29 = arith.cmpf ogt, %27, %28 : vector<128x128xf32>
    %cst_20 = arith.constant 1.000000e-01 : f32
    %30 = vector.broadcast %cst_20 : f32 to vector<128x128xf32>
    %31 = arith.mulf %30, %27 : vector<128x128xf32>
    %32 = arith.select %29, %27, %31 : vector<128x128xi1>, vector<128x128xf32>
    %c0_21 = arith.constant 0 : index
    %c0_22 = arith.constant 0 : index
    %33 = vector.load %arg8[%c0_21, %c0_22] : memref<1x128xf32, #tpu.memory_space<vmem>>, vector<1x128xf32>
    %34 = vector.broadcast %33 : vector<1x128xf32> to vector<128x128xf32>
    %35 = arith.mulf %32, %34 : vector<128x128xf32>
    %cst_23 = arith.constant dense<0.000000e+00> : vector<128xf32>
    %36 = vector.multi_reduction <add>, %35, %cst_23 [1] : vector<128x128xf32> to vector<128xf32>
    %37 = vector.shape_cast %36 : vector<128xf32> to vector<128x1xf32>
    %c0_24 = arith.constant 0 : index
    %c0_25 = arith.constant 0 : index
    %38 = vector.load %arg9[%c0_24, %c0_25] : memref<1x1xf32, #tpu.memory_space<vmem>>, vector<1x1xf32>
    %39 = vector.broadcast %38 : vector<1x1xf32> to vector<128x1xf32>
    %40 = arith.addf %37, %39 : vector<128x1xf32>
    %41 = math.absf %40 : vector<128x1xf32>
    %cst_26 = arith.constant 0.000000e+00 : f32
    %42 = vector.broadcast %cst_26 : f32 to vector<128x1xf32>
    %43 = arith.subf %42, %41 : vector<128x1xf32>
    %44 = math.exp %43 : vector<128x1xf32>
    %cst_27 = arith.constant 1.000000e+00 : f32
    %45 = vector.broadcast %cst_27 : f32 to vector<128x1xf32>
    %46 = arith.addf %45, %44 : vector<128x1xf32>
    %cst_28 = arith.constant 0.000000e+00 : f32
    %47 = vector.broadcast %cst_28 : f32 to vector<128x1xf32>
    %48 = arith.cmpf oge, %40, %47 : vector<128x1xf32>
    %cst_29 = arith.constant 1.000000e+00 : f32
    %49 = vector.broadcast %cst_29 : f32 to vector<128x1xf32>
    %50 = arith.divf %49, %46 : vector<128x1xf32>
    %51 = arith.divf %44, %46 : vector<128x1xf32>
    %52 = arith.select %48, %50, %51 : vector<128x1xi1>, vector<128x1xf32>
    %c0_30 = arith.constant 0 : index
    %c0_31 = arith.constant 0 : index
    %53 = vector.load %arg10[%c0_30, %c0_31] : memref<128x1xf32, #tpu.memory_space<vmem>>, vector<128x1xf32>
    tpu.vector_store %arg10[%c0_30, %c0_31], %52 {strides = array<i32>} : memref<128x1xf32, #tpu.memory_space<vmem>>, vector<128x1xf32>,
    return
  }
  func.func @transform_0(%arg0: i32) -> (i32, i32) {
    %c0_i32 = arith.constant 0 : i32
    %c0_i32_0 = arith.constant 0 : i32
    return %arg0, %c0_i32 : i32, i32
  }
  func.func @transform_1(%arg0: i32) -> (i32, i32) {
    %c0_i32 = arith.constant 0 : i32
    %c0_i32_0 = arith.constant 0 : i32
    %c0_i32_1 = arith.constant 0 : i32
    return %c0_i32, %c0_i32_0 : i32, i32
  }
  func.func @transform_2(%arg0: i32) -> (i32, i32) {
    %c0_i32 = arith.constant 0 : i32
    %c0_i32_0 = arith.constant 0 : i32
    %c0_i32_1 = arith.constant 0 : i32
    return %c0_i32, %c0_i32_0 : i32, i32
  }
  func.func @transform_3(%arg0: i32) -> (i32, i32) {
    %c0_i32 = arith.constant 0 : i32
    %c0_i32_0 = arith.constant 0 : i32
    %c0_i32_1 = arith.constant 0 : i32
    return %c0_i32, %c0_i32_0 : i32, i32
  }
  func.func @transform_4(%arg0: i32) -> (i32, i32) {
    %c0_i32 = arith.constant 0 : i32
    %c0_i32_0 = arith.constant 0 : i32
    %c0_i32_1 = arith.constant 0 : i32
    return %c0_i32, %c0_i32_0 : i32, i32
  }
  func.func @transform_5(%arg0: i32) -> (i32, i32) {
    %c0_i32 = arith.constant 0 : i32
    %c0_i32_0 = arith.constant 0 : i32
    %c0_i32_1 = arith.constant 0 : i32
    return %c0_i32, %c0_i32_0 : i32, i32
  }
  func.func @transform_6(%arg0: i32) -> (i32, i32) {
    %c0_i32 = arith.constant 0 : i32
    %c0_i32_0 = arith.constant 0 : i32
    %c0_i32_1 = arith.constant 0 : i32
    return %c0_i32, %c0_i32_0 : i32, i32
  }
  func.func @transform_7(%arg0: i32) -> (i32, i32) {
    %c0_i32 = arith.constant 0 : i32
    %c0_i32_0 = arith.constant 0 : i32
    %c0_i32_1 = arith.constant 0 : i32
    return %c0_i32, %c0_i32_0 : i32, i32
  }
  func.func @transform_8(%arg0: i32) -> (i32, i32) {
    %c0_i32 = arith.constant 0 : i32
    %c0_i32_0 = arith.constant 0 : i32
    %c0_i32_1 = arith.constant 0 : i32
    return %c0_i32, %c0_i32_0 : i32, i32
  }
  func.func @transform_9(%arg0: i32) -> (i32, i32) {
    %c0_i32 = arith.constant 0 : i32
    %c0_i32_0 = arith.constant 0 : i32
    return %arg0, %c0_i32 : i32, i32
  }
}

</mosaic_0001>

<bundles_post_ra>
// kernel: tpu_custom_call.1
= control target key start
LH: loop header
LB: loop body
LE: loop exit
PB: predicated region body
PF: predicated region fallthrough
CT: control target
= control target key end

     0   :  { %s4246_s0 = inlined_call_operand.hbm [shape: bf16[256,896], index: 0, kind: input, shape index: {}]   ;;  %s4247_s1 = inlined_call_operand.hbm [shape: bf16[896,128], index: 1, kind: input, shape index: {}]   ;;  %s4248_s2 = inlined_call_operand.vmem [shape: f32[1,128], index: 2, kind: input, shape index: {}]   ;;  %s4249_s3 = inlined_call_operand.hbm [shape: bf16[128,256], index: 3, kind: input, shape index: {}]   ;;  %s4250_s4 = inlined_call_operand.vmem [shape: f32[1,256], index: 4, kind: input, shape index: {}]   ;;  %s4251_s5 = inlined_call_operand.hbm [shape: bf16[256,128], index: 5, kind: input, shape index: {}]   ;;  %s4252_s6 = inlined_call_operand.vmem [shape: f32[1,128], index: 6, kind: input, shape index: {}]   ;;  %s4253_s7 = inlined_call_operand.vmem [shape: f32[1,128], index: 7, kind: input, shape index: {}]   ;;  %s4254_s8 = inlined_call_operand.<no memory space> [shape: f32[1,1], index: 8, kind: input, shape index: {}]   ;;  %s4255_s9 = inlined_call_operand.vmem [shape: f32[256,1], index: 9, kind: output, shape index: {}]  }
   0x1   :  { %4263 = sst [smem:[#allocation13_spill]] %s4247_s1  ;;  %v14_v0 = vstv %s4254_s8 }
   0x2   :  { %15 = vst [vmem:[#allocation2] sm:$0x1] %v14_v0 }
   0x3   :  { %16 = vsyncpa [#allocation4], 0 }
   0x4   :  { %18 = vsyncpa [#allocation4 + $0x1], 0 }
   0x5   :  { %19 = vsyncpa [#allocation6], 0 }
   0x6   :  { %20 = vsyncpa [#allocation9], 0  ;;  %s3646_s11 = smov 0   ;;  %s3648_s12 = smov 0  }
   0x7   :  { %s3650_s13 = smov 0   ;;  %s3652_s14 = smov 0  }
   0x8 LB: > { %s4260_s8 = sadd.s32 4294967295, %s3580_s14   ;;  %p46_p0 = scmp.ne.s32.totalorder %s3572_s12, %s3568_s11  ;;  %s3580_s14 = sphi %s3652_s14, %s4280_s14   ;;  %s3576_s13 = sphi %s3650_s13, %s4279_s13   ;;  %s3572_s12 = sphi %s3648_s12, %s4278_s12   ;;  %s3568_s11 = sphi %s3646_s11, %s4277_s11  }
   0x9   : > { %p3668_p1 = scmp.eq.s32.totalorder %s4260_s8, 0  ;;  %p2620_p2 = scmp.ge.s32.totalorder %s3580_s14, 1 }
   0xa   : > { %p251_p3 = scmp.lt.s32.totalorder %s3580_s14, 3  ;;  %s3582_s18 = smov [#allocation5]  }
   0xb   : > { %s4264_s15 = scalar_select %p3668_p1, 1, 0 }
   0xc   : > { %p3676_p4 = por %p3668_p1, %p46_p0  ;;  %p3680_p5 = pnand %p2620_p2, %p251_p3 }
   0xd   : > { %s263_s19 = sshll.u32 %s3582_s18, 4  ;;  %s3583_s21 = smov [#allocation7]   ;;  %s264_s19 = int_to_ptr.vmem [resolvable:$true] %s263_s19 }
   0xe   : > { %s4265_s16 = scalar_select %p3676_p4, 1, 0 }
   0xf   : > { %s4266_s17 = scalar_select %p3680_p5, 1, 0 }
  0x10   : > { %p3121_p6 = pneg %p3680_p5  ;;  %s279_s22 = sshll.u32 %s3583_s21, 4  ;;  %s3692_s22 = int_to_ptr.vmem [resolvable:$true] %s279_s22 }
  0x11   : > { %s4268_s1 = sld [smem:[#allocation13_spill]] }
  0x12   : > { %p3688_p7 = pnand %p3121_p6, %p3668_p1 }
  0x14   : > { %p3702_p9 = pneg %p3688_p7 }
  0x17   : > { %s3424_s25 = scalar_lea.hbm %s4268_s1, 7168 }
  0x18   : > { %p3425_p8 = scmp.ne.s32.totalorder %s4268_s1, %s3424_s25  ;;  %p3431_p12 = scmp.lt.u32.totalorder %s3424_s25, %s4268_s1 }
  0x1a   : > { %p3427_p10 = pnand %p3702_p9, %p3425_p8 }
  0x1c   : > { %p3428_p11 = pneg %p3427_p10 }
  0x1e   : > { %p3433_p13 = pnand %p3431_p12, %p3428_p11 }
  0x20   : > { %3436 = shalt.err (!%p3433_p13)
}
  0x21   : > { %s3437_s10 = scalar_lea.vmem %s264_s19, 7168  ;;  %p3445_p6 = scmp.lt.s32.totalorder %s264_s19, %s264_s19 }
  0x22   : > { %p3438_p0 = scmp.ne.s32.totalorder %s264_s19, %s3437_s10  ;;  %p3446_p1 = scmp.lt.s32.totalorder %s3437_s10, %s3437_s10 }
  0x24   : > { %p3440_p2 = pnand %p3438_p0, %p3702_p9  ;;  %p3447_p4 = por %p3446_p1, %p3445_p6 }
  0x26   : > { %p3441_p3 = pneg %p3440_p2 }
  0x28   : > { %p3448_p5 = pnand %p3447_p4, %p3441_p3 }
  0x2a   : > { %3451 = shalt.err (!%p3448_p5)
}
  0x2b   : > { %s4261_s11 = smov 64   ;;  %s4262_s18 = smov 4  }
  0x2c   : > { %3124 = dma.hbm_to_vmem [thread:$0]  (!%p3688_p7), %s4268_s1, 7168, %s264_s19, [#allocation6], %s4261_s11, %s4261_s11, %s4262_s18  }
  0x2d   : > { %s3452_s26 = scalar_lea.hbm %s4249_s3, 2048 }
  0x2e   : > { %p3453_p1 = scmp.ne.s32.totalorder %s4249_s3, %s3452_s26  ;;  %p3459_p8 = scmp.lt.u32.totalorder %s3452_s26, %s4249_s3 }
  0x30   : > { %p3455_p4 = pnand %p3453_p1, %p3702_p9 }
  0x32   : > { %p3456_p5 = pneg %p3455_p4 }
  0x34   : > { %p3461_p10 = pnand %p3459_p8, %p3456_p5 }
  0x36   : > { %3464 = shalt.err (!%p3461_p10)
}
  0x37   : > { %s3465_s19 = scalar_lea.vmem %s3692_s22, 2048  ;;  %p3473_p0 = scmp.lt.s32.totalorder %s3692_s22, %s3692_s22 }
  0x38   : > { %p3466_p11 = scmp.ne.s32.totalorder %s3692_s22, %s3465_s19  ;;  %p3474_p2 = scmp.lt.s32.totalorder %s3465_s19, %s3465_s19 }
  0x3a   : > { %p3468_p12 = pnand %p3466_p11, %p3702_p9  ;;  %p3475_p3 = por %p3474_p2, %p3473_p0 }
  0x3c   : > { %p3469_p13 = pneg %p3468_p12 }
  0x3e   : > { %p3476_p6 = pnand %p3475_p3, %p3469_p13 }
  0x40   : > { %3479 = shalt.err (!%p3476_p6)
}
  0x41   : > { %s3586_s21 = smov 128   ;;  %s3587_s23 = smov 8  }
  0x42   : > { %3127 = dma.hbm_to_vmem [thread:$0]  (!%p3688_p7), %s4249_s3, 2048, %s3692_s22, [#allocation6], %s3586_s21, %s3586_s21, %s3587_s23  }
  0x43   : > { %s3588_s26 = smov [#allocation8]   ;;  %s3745_s29 = sadd.s32 1, %s3580_s14  }
  0x44   : > { %s295_s27 = sshll.u32 %s3588_s26, 4  ;;  %s3480_s19 = scalar_lea.hbm %s4251_s5, 2048  ;;  %s296_s27 = int_to_ptr.vmem [resolvable:$true] %s295_s27 }
  0x45   : > { %p3481_p1 = scmp.ne.s32.totalorder %s4251_s5, %s3480_s19  ;;  %p3487_p8 = scmp.lt.u32.totalorder %s3480_s19, %s4251_s5 }
  0x47   : > { %p3483_p4 = pnand %p3481_p1, %p3702_p9 }
  0x49   : > { %p3484_p5 = pneg %p3483_p4 }
  0x4b   : > { %p3489_p10 = pnand %p3487_p8, %p3484_p5 }
  0x4d   : > { %3492 = shalt.err (!%p3489_p10)
}
  0x4e   : > { %s3493_s22 = scalar_lea.vmem %s296_s27, 2048  ;;  %p3501_p0 = scmp.lt.s32.totalorder %s296_s27, %s296_s27 }
  0x4f   : > { %p3494_p11 = scmp.ne.s32.totalorder %s296_s27, %s3493_s22  ;;  %p3502_p2 = scmp.lt.s32.totalorder %s3493_s22, %s3493_s22 }
  0x51   : > { %p3496_p12 = pnand %p3494_p11, %p3702_p9  ;;  %p3503_p3 = por %p3502_p2, %p3501_p0 }
  0x53   : > { %p3497_p13 = pneg %p3496_p12 }
  0x55   : > { %p3504_p6 = pnand %p3503_p3, %p3497_p13 }
  0x57   : > { %3507 = shalt.err (!%p3504_p6)
}
  0x58   : > { %s4270_s8 = smov 4   ;;  %s4271_s11 = smov 64  }
  0x59   : > { %3130 = dma.hbm_to_vmem [thread:$0]  (!%p3688_p7), %s4251_s5, 2048, %s296_s27, [#allocation9], %s4271_s11, %s4271_s11, %s4270_s8  }
  0x5a   : > { %s30_s28 = ssub.s32 %s3580_s14, %s3745_s29  ;;  %s33_s21 = sadd.s32 1, %s3576_s13 }
  0x5b   : > { %p31_p9 = scmp.eq.s32.totalorder %s30_s28, 0  ;;  %p40_p1 = scmp.ne.s32.totalorder %s3576_s13, %s3572_s12 }
  0x5c   : > { %p41_p4 = scmp.eq.s32.totalorder %s3580_s14, 0  ;;  %p3138_p5 = scmp.lt.s32.totalorder %s3580_s14, 2 }
  0x5d   : > { %s3776_s20 = scalar_select %p31_p9, %s3576_s13, %s33_s21  }
  0x5e   : > { %p42_p8 = por %p41_p4, %p40_p1  ;;  %s318_s23 = sand.u32 1, %s3576_s13  }
  0x5f   : > { %s3104_s24 = smul.u32 448, %s318_s23  ;;  %s3791_s8 = scalar_lea.sflag [#allocation4], %s318_s23 }
  0x60   : > { %s3105_s25 = smul.u32 7168, %s3580_s14  ;;  %p3780_p10 = pnand %p3138_p5, %p42_p8 }
  0x61   : > { %s322_s19 = scalar_lea.vmem [#allocation3], %s3104_s24  ;;  %s3513_s28 = scalar_lea.hbm %s4246_s0, 14336 }
  0x62   : > { %s3787_s27 = scalar_lea.hbm %s4246_s0, %s3105_s25  ;;  %s330_s22 = sshll.u32 %s322_s19, 4  ;;  %s3789_s22 = int_to_ptr.vmem [resolvable:$true] %s330_s22 }
  0x63   : > { %s3508_s11 = scalar_lea.hbm %s3787_s27, 7168  ;;  %p3510_p11 = pneg %p3780_p10 }
  0x64   : > { %p3509_p7 = scmp.ne.s32.totalorder %s3787_s27, %s3508_s11  ;;  %p3514_p0 = scmp.lt.u32.totalorder %s3787_s27, %s4246_s0 }
  0x65   : > { %p3515_p2 = scmp.lt.u32.totalorder %s3513_s28, %s3508_s11  ;;  %p3517_p6 = scmp.lt.u32.totalorder %s3508_s11, %s3787_s27 }
  0x66   : > { %p3511_p12 = pnand %p3510_p11, %p3509_p7 }
  0x67   : > { %p3516_p3 = por %p3515_p2, %p3514_p0 }
  0x68   : > { %p3512_p13 = pneg %p3511_p12 }
  0x69   : > { %p3518_p9 = por %p3517_p6, %p3516_p3 }
  0x6b   : > { %p3519_p1 = pnand %p3518_p9, %p3512_p13 }
  0x6d   : > { %3522 = shalt.err (!%p3519_p1)
}
  0x6e   : > { %s3523_s23 = scalar_lea.vmem %s3789_s22, 7168  ;;  %s3589_s24 = smov [#allocation3]  }
  0x6f   : > { %p3524_p4 = scmp.ne.s32.totalorder %s3789_s22, %s3523_s23  ;;  %s3528_s30 = sshll.u32 %s3589_s24, 4  ;;  %s3529_s30 = int_to_ptr.vmem [resolvable:$false] %s3528_s30 }
  0x70   : > { %s3530_s10 = scalar_lea.vmem %s3529_s30, 14336  ;;  %p3531_p7 = scmp.lt.s32.totalorder %s3789_s22, %s3529_s30 }
  0x71   : > { %p3526_p5 = pnand %p3524_p4, %p3510_p11  ;;  %p3532_p12 = scmp.lt.s32.totalorder %s3530_s10, %s3523_s23 }
  0x73   : > { %p3527_p8 = pneg %p3526_p5  ;;  %p3533_p0 = por %p3532_p12, %p3531_p7 }
  0x75   : > { %p3534_p2 = pnand %p3533_p0, %p3527_p8 }
  0x77   : > { %3537 = shalt.err (!%p3534_p2)
}
  0x78   : > { %s3590_s19 = smov 448   ;;  %s3591_s11 = smov 28  }
  0x79   : > { %3134 = dma.hbm_to_vmem [thread:$0]  (!%p3780_p10), %s3787_s27, 7168, %s3789_s22, %s3791_s8, %s3590_s19, %s3590_s19, %s3591_s11  }
  0x7a   : > { %p4273_p11 = scmp.ne.s32.totalorder %s4266_s17, 0 }
  0x7b   : > { %s344_s1 = sand.u32 (!%p4273_p11), 1, %s3572_s12   ;;  %p4274_p13 = scmp.ne.s32.totalorder (!%p4273_p11), %s4265_s16, 0 }
  0x7c   : > { %342 = sbr.rel (%p4273_p11) target bundleno = 1141 (0x475), region = 56  ;;  %s345_s28 = scalar_lea.sflag (!%p4273_p11), [#allocation4], %s344_s1 }
  0x7d   : > { %s3106_s18 = smul.u32 (!%p4273_p11), 448, %s344_s1 }
  0x7f   : > { %s3822_s21 = scalar_lea.vmem (!%p4273_p11), [#allocation3], %s3106_s18 }
  0x83   : > { %3555 = dma.done.wait (%p4274_p13), %s345_s28, 7168  }
  0x84   : > { %3557 = vsyncadd (%p4274_p13), %s345_s28, 4294960128  ;;  %p4275_p3 = scmp.ne.s32.totalorder %s4264_s15, 0 }
  0x86   : > { %3559 = dma.done.wait (%p4275_p3), [#allocation6], 9216  }
  0x87   : > { %3561 = vsyncadd (%p4275_p3), [#allocation6], 4294958080 }
  0x88   : > { %3563 = dma.done.wait (%p4275_p3), [#allocation9], 2048  }
  0x89   : > { %3565 = vsyncadd (%p4275_p3), [#allocation9], 4294965248  ;;  %v3184_v1 = vld [vmem:[#allocation5 + $0x40] sm:$0xff]   ;;  %v3188_v5 = vld [vmem:[#allocation5 + $0x48] sm:$0xff]   ;;  %s4276_s23 = sadd.s32 4294967295, %s3580_s14  }
  0x8a   : > { %v3185_v2 = vld [vmem:[#allocation5] sm:$0xff]   ;;  %2784 = vmatprep.subr.bf16.mxu0 %v3184_v1  ;;  %v3189_v6 = vld [vmem:[#allocation5 + $0x8] sm:$0xff]   ;;  %v3192_v9 = vld [vmem:[#allocation5 + $0x50] sm:$0xff]   ;;  %s2632_s24 = sshll.u32 %s4276_s23, 4 }
  0x8b   : > { %v3186_v3 = vld [vmem:[#allocation5 + $0xc0] sm:$0xff]   ;;  %2785 = vmatpush3.bf16.msra.mxu0 %v3185_v2  ;;  %v3190_v7 = vld [vmem:[#allocation5 + $0xc8] sm:$0xff]   ;;  %v3193_v10 = vld [vmem:[#allocation5 + $0x10] sm:$0xff]   ;;  %p397_p10 = scmp.lt.s32.totalorder %s2632_s24, 31 }
  0x8c   : > { %v3187_v4 = vld [vmem:[#allocation5 + $0x80] sm:$0xff]   ;;  %2848 = vmatprep.subr.bf16.mxu1 %v3186_v3  ;;  %2786 = vmatprep.subr.bf16.mxu0 %v3188_v5  ;;  %v3191_v8 = vld [vmem:[#allocation5 + $0x88] sm:$0xff]   ;;  %v3194_v11 = vld [vmem:[#allocation5 + $0xd0] sm:$0xff]  }
  0x8d   : > { %2849 = vmatpush3.bf16.msra.mxu1 %v3187_v4  ;;  %v3195_v12 = vld [vmem:[#allocation5 + $0x90] sm:$0xff]   ;;  %v3196_v13 = vld [vmem:[#allocation5 + $0x58] sm:$0xff]   ;;  %v3200_v17 = vld [vmem:[#allocation5 + $0x60] sm:$0xff]   ;;  %s4282_s24 = smov (!%p397_p10, %s2632_s24), 31 }
  0x8e   : > { %2850 = vmatprep.subr.bf16.mxu1 %v3190_v7  ;;  %v3197_v14 = vld [vmem:[#allocation5 + $0x18] sm:$0xff]   ;;  %v3201_v18 = vld [vmem:[#allocation5 + $0x20] sm:$0xff]   ;;  %v3204_v21 = vld [vmem:[#allocation5 + $0x68] sm:$0xff]   ;;  %s2633_s14 = sshll.u32 %s4282_s24, 3 }
  0x8f   : > { %2787 = vmatpush3.bf16.msra.mxu0 %v3189_v6  ;;  %v3198_v15 = vld [vmem:[#allocation5 + $0xd8] sm:$0xff]   ;;  %v3202_v19 = vld [vmem:[#allocation5 + $0xe0] sm:$0xff]   ;;  %v3205_v22 = vld [vmem:[#allocation5 + $0x28] sm:$0xff]   ;;  %s4151_s19 = scalar_lea.vmem %s4255_s9, %s2633_s14 }
  0x90   : > { %2788 = vmatprep.subr.bf16.mxu0 %v3192_v9  ;;  %v3199_v16 = vld [vmem:[#allocation5 + $0x98] sm:$0xff]   ;;  %v3203_v20 = vld [vmem:[#allocation5 + $0xa0] sm:$0xff]   ;;  %v3206_v23 = vld [vmem:[#allocation5 + $0xe8] sm:$0xff]  }
  0x91   : > { %2851 = vmatpush3.bf16.msra.mxu1 %v3191_v8  ;;  %v3207_v24 = vld [vmem:[#allocation5 + $0xa8] sm:$0xff]   ;;  %v3208_v25 = vld [vmem:[#allocation5 + $0x70] sm:$0xff]   ;;  %v3212_v29 = vld [vmem:[#allocation5 + $0x78] sm:$0xff]  }
  0x92   : > { %2852 = vmatprep.subr.bf16.mxu1 %v3194_v11  ;;  %v3209_v26 = vld [vmem:[#allocation5 + $0x30] sm:$0xff]   ;;  %v3213_v30 = vld [vmem:[#allocation5 + $0x38] sm:$0xff]   ;;  %v3217_v33 = vld [vmem:[%s3822_s21 + $0x4] ss:$28 sps:$4 sm:$0xff]  }
  0x93   : > { %2789 = vmatpush3.bf16.msra.mxu0 %v3193_v10  ;;  %v3210_v27 = vld [vmem:[#allocation5 + $0xf0] sm:$0xff]   ;;  %v3214_v31 = vld [vmem:[#allocation5 + $0xf8] sm:$0xff]   ;;  %1242 = vmatprep.mubr.bf16.mxu0 %v3217_v33  ;;  %v3219_v35 = vld [vmem:[#allocation5 + $0x140] sm:$0xff]  }
  0x94   : > { %2790 = vmatprep.subr.bf16.mxu0 %v3196_v13  ;;  %v3211_v28 = vld [vmem:[#allocation5 + $0xb0] sm:$0xff]   ;;  %v3215_v32 = vld [vmem:[%s3822_s21] ss:$28 sps:$4 sm:$0xff]   ;;  %v3220_v36 = vld [vmem:[%s3822_s21 + $0x8] ss:$28 sps:$4 sm:$0xff]  }
  0x95   : > { %2853 = vmatpush3.bf16.msra.mxu1 %v3195_v12  ;;  %v3218_v34 = vld [vmem:[#allocation5 + $0xb8] sm:$0xff]   ;;  %v3222_v37 = vld [vmem:[%s3822_s21 + $0xc] ss:$28 sps:$4 sm:$0xff]   ;;  %v3223_v38 = vld [vmem:[#allocation5 + $0x100] sm:$0xff]  }
  0x96   : > { %2854 = vmatprep.subr.bf16.mxu1 %v3198_v15  ;;  %1339 = vmatprep.mubr.bf16.mxu1 %v3222_v37  ;;  %v3224_v39 = vld [vmem:[#allocation5 + $0x180] sm:$0xff]   ;;  %v3225_v40 = vld [vmem:[%s3822_s21 + $0x3c] ss:$28 sps:$4 sm:$0xff]   ;;  %v3228_v42 = vld [vmem:[#allocation5 + $0x148] sm:$0xff]  }
  0x97   : > { %2791 = vmatpush3.bf16.msra.mxu0 %v3197_v14  ;;  %v3227_v41 = vld [vmem:[%s3822_s21 + $0x38] ss:$28 sps:$4 sm:$0xff]   ;;  %v3229_v43 = vld [vmem:[%s3822_s21 + $0x44] ss:$28 sps:$4 sm:$0xff]   ;;  %v3231_v44 = vld [vmem:[#allocation5 + $0x108] sm:$0xff]  }
  0x98   : > { %2792 = vmatprep.subr.bf16.mxu0 %v3200_v17  ;;  %v3232_v45 = vld [vmem:[%s3822_s21 + $0x40] ss:$28 sps:$4 sm:$0xff]   ;;  %v3233_v46 = vld [vmem:[#allocation5 + $0x188] sm:$0xff]   ;;  %v3234_v47 = vld [vmem:[%s3822_s21 + $0x74] ss:$28 sps:$4 sm:$0xff]  }
  0x99   : > { %2855 = vmatpush3.bf16.msra.mxu1 %v3199_v16  ;;  %v3237_v48 = vld [vmem:[#allocation5 + $0x150] sm:$0xff]   ;;  %v3238_v49 = vld [vmem:[%s3822_s21 + $0x7c] ss:$28 sps:$4 sm:$0xff]   ;;  %v3243_v53 = vld [vmem:[%s3822_s21 + $0xac] ss:$28 sps:$4 sm:$0xff]  }
  0x9a   : > { %2856 = vmatprep.subr.bf16.mxu1 %v3202_v19  ;;  %v3236_v50 = vld [vmem:[%s3822_s21 + $0x70] ss:$28 sps:$4 sm:$0xff]   ;;  %v3241_v54 = vld [vmem:[%s3822_s21 + $0x78] ss:$28 sps:$4 sm:$0xff]   ;;  %v3245_v59 = vld [vmem:[%s3822_s21 + $0xa8] ss:$28 sps:$4 sm:$0xff]  }
  0x9b   : > { %2793 = vmatpush3.bf16.msra.mxu0 %v3201_v18  ;;  %v3240_v51 = vld [vmem:[#allocation5 + $0x110] sm:$0xff]   ;;  %v3246_v55 = vld [vmem:[#allocation5 + $0x158] sm:$0xff]   ;;  %v3252_v60 = vld [vmem:[%s3822_s21 + $0xe4] ss:$28 sps:$4 sm:$0xff]  }
  0x9c   : > { %2794 = vmatprep.subr.bf16.mxu0 %v3204_v21  ;;  %v3242_v52 = vld [vmem:[#allocation5 + $0x190] sm:$0xff]   ;;  %v3249_v57 = vld [vmem:[#allocation5 + $0x118] sm:$0xff]   ;;  %v3255_v61 = vld [vmem:[#allocation5 + $0x160] sm:$0xff]  }
  0x9d   : > { %2857 = vmatpush3.bf16.msra.mxu1 %v3203_v20  ;;  %v3247_v56 = vld [vmem:[%s3822_s21 + $0xb4] ss:$28 sps:$4 sm:$0xff]   ;;  %v3251_v58 = vld [vmem:[#allocation5 + $0x198] sm:$0xff]   ;;  %v3258_v63 = vld [vmem:[#allocation5 + $0x120] sm:$0xff]  }
  0x9e   : > { %2858 = vmatprep.subr.bf16.mxu1 %v3206_v23  ;;  %v3250_v62 = vld [vmem:[%s3822_s21 + $0xb0] ss:$28 sps:$4 sm:$0xff]   ;;  %v3260_v1 = vld [vmem:[#allocation5 + $0x1a0] sm:$0xff]   ;;  %v3261_v4 = vld [vmem:[%s3822_s21 + $0x11c] ss:$28 sps:$4 sm:$0xff]  }
  0x9f   : > { %2795 = vmatpush3.bf16.msra.mxu0 %v3205_v22  ;;  %v3256_v0 = vld [vmem:[%s3822_s21 + $0xec] ss:$28 sps:$4 sm:$0xff]   ;;  %v3254_v3 = vld [vmem:[%s3822_s21 + $0xe0] ss:$28 sps:$4 sm:$0xff]   ;;  %v3273_v9 = vld [vmem:[#allocation5 + $0x170] sm:$0xff]  }
  0xa0   : > { %2796 = vmatprep.subr.bf16.mxu0 %v3208_v25  ;;  %v3264_v2 = vld [vmem:[#allocation5 + $0x168] sm:$0xff]   ;;  %v3265_v8 = vld [vmem:[%s3822_s21 + $0x124] ss:$28 sps:$4 sm:$0xff]   ;;  %v3263_v10 = vld [vmem:[%s3822_s21 + $0x118] ss:$28 sps:$4 sm:$0xff]  }
  0xa1   : > { %2859 = vmatpush3.bf16.msra.mxu1 %v3207_v24  ;;  %v3267_v5 = vld [vmem:[#allocation5 + $0x128] sm:$0xff]   ;;  %v3276_v11 = vld [vmem:[#allocation5 + $0x130] sm:$0xff]   ;;  %v3268_v13 = vld [vmem:[%s3822_s21 + $0x120] ss:$28 sps:$4 sm:$0xff]  }
  0xa2   : > { %2860 = vmatprep.subr.bf16.mxu1 %v3210_v27  ;;  %v3269_v6 = vld [vmem:[#allocation5 + $0x1a8] sm:$0xff]   ;;  %v3278_v12 = vld [vmem:[#allocation5 + $0x1b0] sm:$0xff]   ;;  %v3282_v15 = vld [vmem:[#allocation5 + $0x178] sm:$0xff]  }
  0xa3   : > { %2797 = vmatpush3.bf16.msra.mxu0 %v3209_v26  ;;  %v3259_v7 = vld [vmem:[%s3822_s21 + $0xe8] ss:$28 sps:$4 sm:$0xff]   ;;  %v3270_v14 = vld [vmem:[%s3822_s21 + $0x154] ss:$28 sps:$4 sm:$0xff]   ;;  %v3274_v16 = vld [vmem:[%s3822_s21 + $0x15c] ss:$28 sps:$4 sm:$0xff]  }
  0xa4   : > { %2798 = vmatprep.subr.bf16.mxu0 %v3212_v29  ;;  %v3285_v17 = vld [vmem:[#allocation5 + $0x138] sm:$0xff]   ;;  %v3272_v19 = vld [vmem:[%s3822_s21 + $0x150] ss:$28 sps:$4 sm:$0xff]   ;;  %v3281_v23 = vld [vmem:[%s3822_s21 + $0x188] ss:$28 sps:$4 sm:$0xff]  }
  0xa5   : > { %2861 = vmatpush3.bf16.msra.mxu1 %v3211_v28  ;;  %v3287_v18 = vld [vmem:[#allocation5 + $0x1b8] sm:$0xff]   ;;  %v3279_v20 = vld [vmem:[%s3822_s21 + $0x18c] ss:$28 sps:$4 sm:$0xff]   ;;  %v3283_v22 = vld [vmem:[%s3822_s21 + $0x194] ss:$28 sps:$4 sm:$0xff]  }
  0xa6   : > { %2862 = vmatprep.subr.bf16.mxu1 %v3214_v31  ;;  %v3277_v21 = vld [vmem:[%s3822_s21 + $0x158] ss:$28 sps:$4 sm:$0xff]   ;;  %v3286_v25 = vld [vmem:[%s3822_s21 + $0x190] ss:$28 sps:$4 sm:$0xff]   ;;  %v3295_v31 = vld [vmem:[%s3822_s21 + $0x48] ss:$28 sps:$4 sm:$0xff]  }
  0xa7   : > { %2799 = vmatpush3.bf16.msra.mxu0 %v3213_v30  ;;  %v3290_v24 = vld [vmem:[%s3822_s21 + $0x14] ss:$28 sps:$4 sm:$0xff]   ;;  %v3293_v28 = vld [vmem:[%s3822_s21 + $0x4c] ss:$28 sps:$4 sm:$0xff]   ;;  %v3300_v33 = vld [vmem:[%s3822_s21 + $0xc0] ss:$28 sps:$4 sm:$0xff]  }
  0xa8   : > { %2912 = vmatprep.subr.bf16.mxu0 %v3219_v35  ;;  %v3291_v26 = vld [vmem:[%s3822_s21 + $0x18] ss:$28 sps:$4 sm:$0xff]   ;;  %v3288_v27 = vld [vmem:[%s3822_s21 + $0x10] ss:$28 sps:$4 sm:$0xff]   ;;  %v3299_v30 = vld [vmem:[%s3822_s21 + $0x88] ss:$28 sps:$4 sm:$0xff]  }
  0xa9   : > { %2863 = vmatpush3.bf16.msra.mxu1 %v3218_v34  ;;  %v3292_v29 = vld [vmem:[%s3822_s21 + $0x50] ss:$28 sps:$4 sm:$0xff]   ;;  %v3307_v34 = vld [vmem:[%s3822_s21 + $0xf8] ss:$28 sps:$4 sm:$0xff]   ;;  %v3298_v35 = vld [vmem:[%s3822_s21 + $0x80] ss:$28 sps:$4 sm:$0xff]  }
  0xaa   : > { %1243 = vmatmul.mubr.bf16.vlgmr.msra.gmra.mrb[0].mxu0 %v3215_v32  ;;  %3056 = vmatprep.subr.bf16.mxu1 %v3224_v39  ;;  %v3296_v32 = vld [vmem:[%s3822_s21 + $0x84] ss:$28 sps:$4 sm:$0xff]   ;;  %v3308_v37 = vld [vmem:[%s3822_s21 + $0x130] ss:$28 sps:$4 sm:$0xff]  }
  0xab   : > { %2913 = vmatpush3.bf16.msra.mxu0 %v3223_v38  ;;  %1250 = vmatprep.mubr.bf16.mxu0 %v3225_v40  ;;  %v3315_v38 = vld [vmem:[%s3822_s21 + $0x168] ss:$28 sps:$4 sm:$0xff]   ;;  %v3304_v40 = vld [vmem:[%s3822_s21 + $0xf4] ss:$28 sps:$4 sm:$0xff]  }
  0xac   : > { %1340 = vmatmul.mubr.bf16.vlgmr.msra.gmra.mrb[0].mxu1 %v3220_v36  ;;  %2914 = vmatprep.subr.bf16.mxu0 %v3228_v42  ;;  %v3301_v36 = vld [vmem:[%s3822_s21 + $0xbc] ss:$28 sps:$4 sm:$0xff]   ;;  %v3306_v42 = vld [vmem:[%s3822_s21 + $0xf0] ss:$28 sps:$4 sm:$0xff]  }
  0xad   : > { %3057 = vmatpush3.bf16.msra.mxu1 %v3224_v39  ;;  %1347 = vmatprep.mubr.bf16.mxu1 %v3229_v43  ;;  %v3303_v39 = vld [vmem:[%s3822_s21 + $0xb8] ss:$28 sps:$4 sm:$0xff]   ;;  %v3309_v43 = vld [vmem:[%s3822_s21 + $0x12c] ss:$28 sps:$4 sm:$0xff]  }
  0xae   : > { %3058 = vmatprep.subr.bf16.mxu1 %v3233_v46 }
  0xaf   : > { %2915 = vmatpush3.bf16.msra.mxu0 %v3231_v44  ;;  %v3311_v44 = vld [vmem:[%s3822_s21 + $0x128] ss:$28 sps:$4 sm:$0xff]  }
  0xb0   : > { %2916 = vmatprep.subr.bf16.mxu0 %v3237_v48  ;;  %v3319_v48 = vld [vmem:[%s3822_s21 + $0x198] ss:$28 sps:$4 sm:$0xff]  }
  0xb1   : > { %3059 = vmatpush3.bf16.msra.mxu1 %v3233_v46  ;;  %v3314_v46 = vld [vmem:[%s3822_s21 + $0x160] ss:$28 sps:$4 sm:$0xff]  }
  0xb2   : > { %1251 = vmatmul.mubr.bf16.gmra.mrb[4].mxu0 %v3227_v41  ;;  %3060 = vmatprep.subr.bf16.mxu1 %v3242_v52  ;;  %v3316_v41 = vld [vmem:[%s3822_s21 + $0x1a0] ss:$28 sps:$4 sm:$0xff]  }
  0xb3   : > { %1258 = vmatprep.mubr.bf16.mxu0 %v3234_v47  ;;  %2917 = vmatpush3.bf16.msra.mxu0 %v3240_v51  ;;  %v3317_v47 = vld [vmem:[%s3822_s21 + $0x19c] ss:$28 sps:$4 sm:$0xff]  }
  0xb4   : > { %1348 = vmatmul.mubr.bf16.gmra.mrb[4].mxu1 %v3232_v45  ;;  %2918 = vmatprep.subr.bf16.mxu0 %v3246_v55  ;;  %v3312_v45 = vld [vmem:[%s3822_s21 + $0x164] ss:$28 sps:$4 sm:$0xff]   ;;  %v3325_v51 = vld [vmem:[#allocation7 + $0x14] ss:$8 sps:$4 sm:$0xff]  }
  0xb5   : > { %1355 = vmatprep.mubr.bf16.mxu1 %v3238_v49  ;;  %3061 = vmatpush3.bf16.msra.mxu1 %v3242_v52  ;;  %v3322_v49 = vld [vmem:[#allocation7 + $0x4] ss:$8 sps:$4 sm:$0xff]   ;;  %v3323_v52 = vld [vmem:[#allocation7 + $0x10] ss:$8 sps:$4 sm:$0xff]   ;;  %v3331_v55 = vld [vmem:[#allocation7 + $0x34] ss:$8 sps:$4 sm:$0xff]  }
  0xb6   : > { %3062 = vmatprep.subr.bf16.mxu1 %v3251_v58 }
  0xb7   : > { %2919 = vmatpush3.bf16.msra.mxu0 %v3249_v57  ;;  %v3334_v57 = vld [vmem:[#allocation7 + $0x44] ss:$8 sps:$4 sm:$0xff]  }
  0xb8   : > { %2920 = vmatprep.subr.bf16.mxu0 %v3255_v61  ;;  %v3340_v61 = vld [vmem:[#allocation7 + $0x64] ss:$8 sps:$4 sm:$0xff]  }
  0xb9   : > { %3063 = vmatpush3.bf16.msra.mxu1 %v3251_v58  ;;  %v3332_v58 = vld [vmem:[#allocation7 + $0x40] ss:$8 sps:$4 sm:$0xff]  }
  0xba   : > { %1259 = vmatmul.mubr.bf16.gmra.mrb[8].mxu0 %v3236_v50  ;;  %3064 = vmatprep.subr.bf16.mxu1 %v3260_v1  ;;  %v3320_v50 = vld [vmem:[#allocation7] ss:$8 sps:$4 sm:$0xff]  }
  0xbb   : > { %1266 = vmatprep.mubr.bf16.mxu0 %v3243_v53  ;;  %2921 = vmatpush3.bf16.msra.mxu0 %v3258_v63  ;;  %v3328_v53 = vld [vmem:[#allocation7 + $0x24] ss:$8 sps:$4 sm:$0xff]   ;;  %v3343_v63 = vld [vmem:[#allocation7 + $0x74] ss:$8 sps:$4 sm:$0xff]  }
  0xbc   : > { %1356 = vmatmul.mubr.bf16.gmra.mrb[8].mxu1 %v3241_v54  ;;  %2922 = vmatprep.subr.bf16.mxu0 %v3264_v2  ;;  %v3326_v54 = vld [vmem:[#allocation7 + $0x20] ss:$8 sps:$4 sm:$0xff]  }
  0xbd   : > { %1363 = vmatprep.mubr.bf16.mxu1 %v3247_v56  ;;  %3065 = vmatpush3.bf16.msra.mxu1 %v3260_v1  ;;  %v3329_v56 = vld [vmem:[#allocation7 + $0x30] ss:$8 sps:$4 sm:$0xff]   ;;  %v3592_v1 = vmov 0  }
  0xbe   : > { %3066 = vmatprep.subr.bf16.mxu1 %v3269_v6 }
  0xbf   : > { %2923 = vmatpush3.bf16.msra.mxu0 %v3267_v5 }
  0xc0   : > { %2924 = vmatprep.subr.bf16.mxu0 %v3273_v9 }
  0xc1   : > { %3067 = vmatpush3.bf16.msra.mxu1 %v3269_v6 }
  0xc2   : > { %1267 = vmatmul.mubr.bf16.gmra.mrb[12].mxu0 %v3245_v59  ;;  %3068 = vmatprep.subr.bf16.mxu1 %v3278_v12  ;;  %v3337_v59 = vld [vmem:[#allocation7 + $0x54] ss:$8 sps:$4 sm:$0xff]  }
  0xc3   : > { %1274 = vmatprep.mubr.bf16.mxu0 %v3252_v60  ;;  %2925 = vmatpush3.bf16.msra.mxu0 %v3276_v11  ;;  %v3335_v60 = vld [vmem:[#allocation7 + $0x50] ss:$8 sps:$4 sm:$0xff]  }
  0xc4   : > { %1364 = vmatmul.mubr.bf16.gmra.mrb[12].mxu1 %v3250_v62  ;;  %2926 = vmatprep.subr.bf16.mxu0 %v3282_v15  ;;  %v3338_v62 = vld [vmem:[#allocation7 + $0x60] ss:$8 sps:$4 sm:$0xff]  }
  0xc5   : > { %1371 = vmatprep.mubr.bf16.mxu1 %v3256_v0  ;;  %3069 = vmatpush3.bf16.msra.mxu1 %v3278_v12  ;;  %v3341_v0 = vld [vmem:[#allocation7 + $0x70] ss:$8 sps:$4 sm:$0xff]  }
  0xc6   : > { %3070 = vmatprep.subr.bf16.mxu1 %v3287_v18 }
  0xc7   : > { %2927 = vmatpush3.bf16.msra.mxu0 %v3285_v17 }
  0xc9   : > { %3071 = vmatpush3.bf16.msra.mxu1 %v3287_v18  ;;  %v3344_v18 = vld [vmem:[#allocation8 + $0x40] sm:$0xff]  }
  0xca   : > { %1275 = vmatmul.mubr.bf16.gmra.mrb[16].mxu0 %v3254_v3  ;;  %1762 = vmatprep.subr.bf16.mxu1 %v3322_v49  ;;  %v3896_v3 = vld [vmem:[%s4248_s2] ss:$0 sm:$0xff]  ;;  %v3930_v49 = vld [vmem:[#allocation8 + $0x60] sm:$0xff]  }
  0xcb   : > { %1282 = vmatprep.mubr.bf16.mxu0 %v3261_v4  ;;  %2992 = vmatprep.subr.bf16.mxu0 %v3344_v18 }
  0xcc   : > { %1372 = vmatmul.mubr.bf16.gmra.mrb[16].mxu1 %v3259_v7 }
  0xcd   : > { %1379 = vmatprep.mubr.bf16.mxu1 %v3265_v8 }
  0xd2   : > { %1283 = vmatmul.mubr.bf16.gmra.mrb[20].mxu0 %v3263_v10 }
  0xd3   : > { %1290 = vmatprep.mubr.bf16.mxu0 %v3270_v14 }
  0xd4   : > { %1380 = vmatmul.mubr.bf16.gmra.mrb[20].mxu1 %v3268_v13 }
  0xd5   : > { %1387 = vmatprep.mubr.bf16.mxu1 %v3274_v16 }
  0xda   : > { %1291 = vmatmul.mubr.bf16.gmra.mrb[24].mxu0 %v3272_v19  ;;  %v3902_v19 = vld [vmem:[#allocation8] sm:$0xff]  }
  0xdb   : > { %1298 = vmatprep.mubr.bf16.mxu0 %v3279_v20  ;;  %v3904_v20 = vld [vmem:[#allocation8 + $0x48] sm:$0xff]  }
  0xdc   : > { %1388 = vmatmul.mubr.bf16.gmra.mrb[24].mxu1 %v3277_v21 }
  0xdd   : > { %1395 = vmatprep.mubr.bf16.mxu1 %v3283_v22 }
  0xe2   : > { %1299 = vmatmul.mubr.bf16.gmra.mrb[28].mxu0 %v3281_v23 }
  0xe3   : > { %1436 = vmatprep.mubr.bf16.mxu0 %v3290_v24 }
  0xe4   : > { %1396 = vmatmul.mubr.bf16.gmra.mrb[28].mxu1 %v3286_v25 }
  0xe5   : > { %3072 = vmatprep.mubr.bf16.mxu1 %v3291_v26  ;;  %v3909_v26 = vld [vmem:[#allocation8 + $0x8] sm:$0xff]  }
  0xea   : > { %1437 = vmatmul.mubr.bf16.vlgmr.msra.gmra.mrb[32].mxu0 %v3288_v27 }
  0xeb   : > { %1444 = vmatprep.mubr.bf16.mxu0 %v3293_v28  ;;  %2993 = vmatpush3.bf16.msra.mxu0 %v3902_v19 }
  0xec   : > { %3073 = vmatmul.mubr.bf16.vlgmr.msra.gmra.mrb[32].mxu1 %v3292_v29  ;;  %2994 = vmatprep.subr.bf16.mxu0 %v3904_v20  ;;  %v3912_v29 = vld [vmem:[#allocation8 + $0x50] sm:$0xff]  }
  0xed   : > { %3076 = vmatprep.mubr.bf16.mxu1 %v3299_v30  ;;  %1763 = vmatpush1.bf16.msra.mxu1 %v3320_v50 }
  0xee   : > { %1764 = vmatprep.subr.bf16.mxu1 %v3325_v51 }
  0xef   : > { %2995 = vmatpush3.bf16.msra.mxu0 %v3909_v26 }
  0xf0   : > { %2996 = vmatprep.subr.bf16.mxu0 %v3912_v29 }
  0xf1   : > { %1765 = vmatpush1.bf16.msra.mxu1 %v3323_v52 }
  0xf2   : > { %1445 = vmatmul.mubr.bf16.gmra.mrb[36].mxu0 %v3295_v31  ;;  %1766 = vmatprep.subr.bf16.mxu1 %v3328_v53 }
  0xf3   : > { %1452 = vmatprep.mubr.bf16.mxu0 %v3296_v32 }
  0xf4   : > { %3077 = vmatmul.mubr.bf16.gmra.mrb[36].mxu1 %v3300_v33 }
  0xf5   : > { %3080 = vmatprep.mubr.bf16.mxu1 %v3307_v34  ;;  %1767 = vmatpush1.bf16.msra.mxu1 %v3326_v54 }
  0xf6   : > { %1768 = vmatprep.subr.bf16.mxu1 %v3331_v55 }
  0xf9   : > { %1769 = vmatpush1.bf16.msra.mxu1 %v3329_v56 }
  0xfa   : > { %1453 = vmatmul.mubr.bf16.gmra.mrb[40].mxu0 %v3298_v35  ;;  %1770 = vmatprep.subr.bf16.mxu1 %v3334_v57  ;;  %v3935_v57 = vld [vmem:[#allocation8 + $0x20] sm:$0xff]  }
  0xfb   : > { %1460 = vmatprep.mubr.bf16.mxu0 %v3301_v36 }
  0xfc   : > { %3081 = vmatmul.mubr.bf16.gmra.mrb[40].mxu1 %v3308_v37  ;;  %v3917_v37 = vld [vmem:[#allocation8 + $0x10] sm:$0xff]  }
  0xfd   : > { %3084 = vmatprep.mubr.bf16.mxu1 %v3315_v38  ;;  %1771 = vmatpush1.bf16.msra.mxu1 %v3332_v58 }
  0xfe   : > { %1772 = vmatprep.subr.bf16.mxu1 %v3337_v59  ;;  %2997 = vmatpush3.bf16.msra.mxu0 %v3917_v37 }
 0x101   : > { %1773 = vmatpush1.bf16.msra.mxu1 %v3335_v60  ;;  %v3940_v60 = vld [vmem:[#allocation8 + $0x68] sm:$0xff]  }
 0x102   : > { %1461 = vmatmul.mubr.bf16.gmra.mrb[44].mxu0 %v3303_v39  ;;  %1774 = vmatprep.subr.bf16.mxu1 %v3340_v61 }
 0x103   : > { %1468 = vmatprep.mubr.bf16.mxu0 %v3304_v40  ;;  %v3922_v40 = vld [vmem:[#allocation8 + $0x58] sm:$0xff]  }
 0x104   : > { %3085 = vmatmul.mubr.bf16.gmra.mrb[44].mxu1 %v3316_v41  ;;  %2998 = vmatprep.subr.bf16.mxu0 %v3922_v40 }
 0x105   : > { %1775 = vmatpush1.bf16.msra.mxu1 %v3338_v62  ;;  %1794 = vmatprep.mubr.bf16.mxu1 %v3592_v1 }
 0x106   : > { %1776 = vmatprep.subr.bf16.mxu1 %v3343_v63 }
 0x109   : > { %1777 = vmatpush1.bf16.msra.mxu1 %v3341_v0 }
 0x10a   : > { %1469 = vmatmul.mubr.bf16.gmra.mrb[48].mxu0 %v3306_v42  ;;  %3088 = vmatprep.subr.bf16.mxu1 %v3344_v18 }
 0x10b   : > { %1476 = vmatprep.mubr.bf16.mxu0 %v3309_v43 }
 0x112   : > { %1477 = vmatmul.mubr.bf16.gmra.mrb[52].mxu0 %v3311_v44 }
 0x113   : > { %1484 = vmatprep.mubr.bf16.mxu0 %v3312_v45 }
 0x11a   : > { %1485 = vmatmul.mubr.bf16.gmra.mrb[56].mxu0 %v3314_v46  ;;  %v3927_v46 = vld [vmem:[#allocation8 + $0x18] sm:$0xff]  }
 0x11b   : > { %1492 = vmatprep.mubr.bf16.mxu0 %v3317_v47  ;;  %2999 = vmatpush3.bf16.msra.mxu0 %v3927_v46 }
 0x11c   : > { %3000 = vmatprep.subr.bf16.mxu0 %v3930_v49 }
 0x11f   : > { %3001 = vmatpush3.bf16.msra.mxu0 %v3935_v57 }
 0x120   : > { %3002 = vmatprep.subr.bf16.mxu0 %v3940_v60 }
 0x122   : > { %1493 = vmatmul.mubr.bf16.gmra.mrb[60].mxu0 %v3319_v48 }
 0x17d   : > { %v2800_v2 = vpop.f32.mrb[0].mxu0 }
 0x17e   : > { %v2801_v4 = vpop.f32.mrb[1].mxu0 }
 0x17f   : > { %v2802_v5 = vadd.f32 %v2801_v4, %v2800_v2  ;;  %v2803_v6 = vpop.f32.mrb[2].mxu0  ;;  %v2864_v7 = vpop.f32.mrb[0].mxu1  ;;  %v3945_v4 = vld [vmem:[#allocation8 + $0x28] sm:$0xff]  }
 0x180   : > { %v2804_v8 = vpop.f32.mrb[3].mxu0  ;;  %v2865_v11 = vpop.f32.mrb[1].mxu1  ;;  %3003 = vmatpush3.bf16.msra.mxu0 %v3945_v4 }
 0x181   : > { %v1245_v9 = vadd.f32 %v2802_v5, %v3896_v3  ;;  %v2805_v10 = vadd.f32 %v2804_v8, %v2803_v6  ;;  %v2866_v12 = vadd.f32 %v2865_v11, %v2864_v7  ;;  %v2867_v13 = vpop.f32.mrb[2].mxu1 }
 0x182   : > { %v2868_v15 = vpop.f32.mrb[3].mxu1 }
 0x183   : > { %v1248_v14 = vadd.f32 %v2805_v10, %v3896_v3  ;;  %v3900_v16 = vadd.f32 %v2866_v12, %v1245_v9  ;;  %v2869_v17 = vadd.f32 %v2868_v15, %v2867_v13 }
 0x185   : > { %v2806_v21 = vpop.f32.mrb[4].mxu0  ;;  %v3906_v22 = vadd.f32 %v2869_v17, %v1248_v14 }
 0x186   : > { %v2807_v23 = vpop.f32.mrb[5].mxu0 }
 0x187   : > { %v2808_v24 = vadd.f32 %v2807_v23, %v2806_v21  ;;  %v2809_v25 = vpop.f32.mrb[6].mxu0  ;;  %v2870_v27 = vpop.f32.mrb[4].mxu1 }
 0x188   : > { %v2810_v28 = vpop.f32.mrb[7].mxu0  ;;  %v2871_v32 = vpop.f32.mrb[5].mxu1 }
 0x189   : > { %v1253_v30 = vadd.f32 %v2808_v24, %v3896_v3  ;;  %v2811_v31 = vadd.f32 %v2810_v28, %v2809_v25  ;;  %v2872_v33 = vadd.f32 %v2871_v32, %v2870_v27  ;;  %v2873_v34 = vpop.f32.mrb[6].mxu1 }
 0x18a   : > { %v2874_v36 = vpop.f32.mrb[7].mxu1 }
 0x18b   : > { %v1256_v35 = vadd.f32 %v2811_v31, %v3896_v3  ;;  %v3919_v38 = vadd.f32 %v2872_v33, %v1253_v30  ;;  %v2875_v39 = vadd.f32 %v2874_v36, %v2873_v34 }
 0x18d   : > { %v2812_v41 = vpop.f32.mrb[8].mxu0  ;;  %v3924_v42 = vadd.f32 %v2875_v39, %v1256_v35 }
 0x18e   : > { %v2813_v43 = vpop.f32.mrb[9].mxu0 }
 0x18f   : > { %v2814_v44 = vadd.f32 %v2813_v43, %v2812_v41  ;;  %v2815_v45 = vpop.f32.mrb[10].mxu0  ;;  %v2876_v47 = vpop.f32.mrb[8].mxu1 }
 0x190   : > { %v2816_v48 = vpop.f32.mrb[11].mxu0  ;;  %v2877_v52 = vpop.f32.mrb[9].mxu1 }
 0x191   : > { %v1261_v50 = vadd.f32 %v2814_v44, %v3896_v3  ;;  %v2817_v51 = vadd.f32 %v2816_v48, %v2815_v45  ;;  %v2878_v53 = vadd.f32 %v2877_v52, %v2876_v47  ;;  %v2879_v54 = vpop.f32.mrb[10].mxu1 }
 0x192   : > { %v2880_v56 = vpop.f32.mrb[11].mxu1 }
 0x193   : > { %v1264_v55 = vadd.f32 %v2817_v51, %v3896_v3  ;;  %v3937_v58 = vadd.f32 %v2878_v53, %v1261_v50  ;;  %v2881_v59 = vadd.f32 %v2880_v56, %v2879_v54 }
 0x195   : > { %v2818_v61 = vpop.f32.mrb[12].mxu0  ;;  %v3942_v62 = vadd.f32 %v2881_v59, %v1264_v55 }
 0x196   : > { %v2819_v63 = vpop.f32.mrb[13].mxu0 }
 0x197   : > { %v2820_v0 = vadd.f32 %v2819_v63, %v2818_v61  ;;  %v2821_v2 = vpop.f32.mrb[14].mxu0  ;;  %v2882_v5 = vpop.f32.mrb[12].mxu1 }
 0x198   : > { %v2822_v6 = vpop.f32.mrb[15].mxu0  ;;  %v2883_v9 = vpop.f32.mrb[13].mxu1 }
 0x199   : > { %v1269_v7 = vadd.f32 %v2820_v0, %v3896_v3  ;;  %v2823_v8 = vadd.f32 %v2822_v6, %v2821_v2  ;;  %v2884_v10 = vadd.f32 %v2883_v9, %v2882_v5  ;;  %v2885_v11 = vpop.f32.mrb[14].mxu1 }
 0x19a   : > { %v2886_v13 = vpop.f32.mrb[15].mxu1 }
 0x19b   : > { %v1272_v12 = vadd.f32 %v2823_v8, %v3896_v3  ;;  %v3951_v14 = vadd.f32 %v2884_v10, %v1269_v7  ;;  %v2887_v15 = vadd.f32 %v2886_v13, %v2885_v11 }
 0x19d   : > { %v2824_v17 = vpop.f32.mrb[16].mxu0  ;;  %v3953_v18 = vadd.f32 %v2887_v15, %v1272_v12 }
 0x19e   : > { %v2825_v21 = vpop.f32.mrb[17].mxu0 }
 0x19f   : > { %v2826_v23 = vadd.f32 %v2825_v21, %v2824_v17  ;;  %v2827_v24 = vpop.f32.mrb[18].mxu0  ;;  %v2888_v25 = vpop.f32.mrb[16].mxu1 }
 0x1a0   : > { %v2828_v27 = vpop.f32.mrb[19].mxu0  ;;  %v2889_v31 = vpop.f32.mrb[17].mxu1 }
 0x1a1   : > { %v1277_v28 = vadd.f32 %v2826_v23, %v3896_v3  ;;  %v2829_v30 = vadd.f32 %v2828_v27, %v2827_v24  ;;  %v2890_v32 = vadd.f32 %v2889_v31, %v2888_v25  ;;  %v2891_v33 = vpop.f32.mrb[18].mxu1 }
 0x1a2   : > { %v2892_v35 = vpop.f32.mrb[19].mxu1 }
 0x1a3   : > { %v1280_v34 = vadd.f32 %v2829_v30, %v3896_v3  ;;  %v3957_v36 = vadd.f32 %v2890_v32, %v1277_v28  ;;  %v2893_v39 = vadd.f32 %v2892_v35, %v2891_v33 }
 0x1a5   : > { %v2830_v41 = vpop.f32.mrb[20].mxu0  ;;  %v3959_v43 = vadd.f32 %v2893_v39, %v1280_v34 }
 0x1a6   : > { %v2831_v44 = vpop.f32.mrb[21].mxu0 }
 0x1a7   : > { %v2832_v45 = vadd.f32 %v2831_v44, %v2830_v41  ;;  %v2833_v47 = vpop.f32.mrb[22].mxu0  ;;  %v2894_v48 = vpop.f32.mrb[20].mxu1 }
 0x1a8   : > { %v2834_v50 = vpop.f32.mrb[23].mxu0  ;;  %v2895_v53 = vpop.f32.mrb[21].mxu1 }
 0x1a9   : > { %v1285_v51 = vadd.f32 %v2832_v45, %v3896_v3  ;;  %v2835_v52 = vadd.f32 %v2834_v50, %v2833_v47  ;;  %v2896_v54 = vadd.f32 %v2895_v53, %v2894_v48  ;;  %v2897_v55 = vpop.f32.mrb[22].mxu1 }
 0x1aa   : > { %v2898_v59 = vpop.f32.mrb[23].mxu1 }
 0x1ab   : > { %v1288_v56 = vadd.f32 %v2835_v52, %v3896_v3  ;;  %v3963_v61 = vadd.f32 %v2896_v54, %v1285_v51  ;;  %v2899_v63 = vadd.f32 %v2898_v59, %v2897_v55 }
 0x1ad   : > { %v2836_v0 = vpop.f32.mrb[24].mxu0  ;;  %v3965_v2 = vadd.f32 %v2899_v63, %v1288_v56 }
 0x1ae   : > { %v2837_v5 = vpop.f32.mrb[25].mxu0 }
 0x1af   : > { %v2838_v6 = vadd.f32 %v2837_v5, %v2836_v0  ;;  %v2839_v7 = vpop.f32.mrb[26].mxu0  ;;  %v2900_v8 = vpop.f32.mrb[24].mxu1 }
 0x1b0   : > { %v2840_v9 = vpop.f32.mrb[27].mxu0  ;;  %v2901_v12 = vpop.f32.mrb[25].mxu1 }
 0x1b1   : > { %v1293_v10 = vadd.f32 %v2838_v6, %v3896_v3  ;;  %v2841_v11 = vadd.f32 %v2840_v9, %v2839_v7  ;;  %v2902_v13 = vadd.f32 %v2901_v12, %v2900_v8  ;;  %v2903_v15 = vpop.f32.mrb[26].mxu1 }
 0x1b2   : > { %v2904_v21 = vpop.f32.mrb[27].mxu1 }
 0x1b3   : > { %v1296_v17 = vadd.f32 %v2841_v11, %v3896_v3  ;;  %v3969_v23 = vadd.f32 %v2902_v13, %v1293_v10  ;;  %v2905_v24 = vadd.f32 %v2904_v21, %v2903_v15 }
 0x1b5   : > { %v2842_v25 = vpop.f32.mrb[28].mxu0  ;;  %v3971_v27 = vadd.f32 %v2905_v24, %v1296_v17 }
 0x1b6   : > { %v2843_v28 = vpop.f32.mrb[29].mxu0 }
 0x1b7   : > { %v2844_v30 = vadd.f32 %v2843_v28, %v2842_v25  ;;  %v2845_v31 = vpop.f32.mrb[30].mxu0  ;;  %v2906_v32 = vpop.f32.mrb[28].mxu1 }
 0x1b8   : > { %v2846_v33 = vpop.f32.mrb[31].mxu0  ;;  %v2907_v39 = vpop.f32.mrb[29].mxu1 }
 0x1b9   : > { %v1301_v34 = vadd.f32 %v2844_v30, %v3896_v3  ;;  %v2847_v35 = vadd.f32 %v2846_v33, %v2845_v31  ;;  %v2908_v41 = vadd.f32 %v2907_v39, %v2906_v32  ;;  %v2909_v44 = vpop.f32.mrb[30].mxu1 }
 0x1ba   : > { %v2910_v47 = vpop.f32.mrb[31].mxu1 }
 0x1bb   : > { %v1304_v45 = vadd.f32 %v2847_v35, %v3896_v3  ;;  %v3975_v48 = vadd.f32 %v2908_v41, %v1301_v34  ;;  %v2911_v50 = vadd.f32 %v2910_v47, %v2909_v44 }
 0x1bd   : > { %v2928_v51 = vpop.f32.mrb[32].mxu0  ;;  %v3977_v52 = vadd.f32 %v2911_v50, %v1304_v45 }
 0x1be   : > { %v2929_v53 = vpop.f32.mrb[33].mxu0 }
 0x1bf   : > { %v2930_v54 = vadd.f32 %v2929_v53, %v2928_v51  ;;  %v2931_v55 = vpop.f32.mrb[34].mxu0  ;;  %v3074_v56 = vpop.f32.mrb[32].mxu1 }
 0x1c0   : > { %v2932_v59 = vpop.f32.mrb[35].mxu0  ;;  %v1535_v5 = vpop.f32.mrb[33].mxu1 }
 0x1c1   : > { %v2933_v63 = vadd.f32 %v2932_v59, %v2931_v55  ;;  %v1439_v0 = vadd.f32 %v2930_v54, %v3900_v16  ;;  %v3075_v6 = vpop.f32.mrb[34].mxu1 }
 0x1c2   : > { %v1538_v8 = vpop.f32.mrb[35].mxu1 }
 0x1c3   : > { %v1536_v7 = vadd.f32 %v1535_v5, %v1439_v0  ;;  %v1442_v3 = vadd.f32 %v2933_v63, %v3906_v22 }
 0x1c5   : > { %v1614_v9 = vmul.f32 0.1, %v1536_v7  ;;  %v1539_v10 = vadd.f32 %v1538_v8, %v1442_v3  ;;  %v2934_v11 = vpop.f32.mrb[36].mxu0  ;;  %vm1598_vm0 = vcmp.gt.f32.partialorder %v1536_v7, 0.0 }
 0x1c6   : > { %v2935_v12 = vpop.f32.mrb[37].mxu0 }
 0x1c7   : > { %vm1599_vm1 = vcmp.gt.f32.partialorder %v1539_v10, 0.0  ;;  %v1615_v13 = vmul.f32 0.1, %v1539_v10  ;;  %v2936_v15 = vadd.f32 %v2935_v12, %v2934_v11  ;;  %v2937_v17 = vpop.f32.mrb[38].mxu0  ;;  %v3078_v24 = vpop.f32.mrb[36].mxu1  ;;  %v1630_v25 = vsel %vm1598_vm0, %v1536_v7, %v1614_v9 }
 0x1c8   : > { %v2938_v21 = vpop.f32.mrb[39].mxu0  ;;  %v1551_v31 = vpop.f32.mrb[37].mxu1 }
 0x1c9   : > { %v1631_v28 = vsel %vm1599_vm1, %v1539_v10, %v1615_v13  ;;  %v1447_v16 = vadd.f32 %v2936_v15, %v3919_v38  ;;  %v2939_v30 = vadd.f32 %v2938_v21, %v2937_v17  ;;  %v3079_v22 = vpop.f32.mrb[38].mxu1 }
 0x1ca   : > { %v1646_v32 = vpack.c.bf16 %v1631_v28, %v1630_v25  ;;  %v1554_v35 = vpop.f32.mrb[39].mxu1 }
 0x1cb   : > { %v1544_v33 = vadd.f32 %v3074_v56, %v1447_v16  ;;  %v1450_v34 = vadd.f32 %v2939_v30, %v3924_v42 }
 0x1cc   : > { %1795 = vmatmul.mubr.bf16.vlgmr.msra.gmra.mrb[48].mxu1 %v1646_v32 }
 0x1cd   : > { %v1616_v39 = vmul.f32 0.1, %v1544_v33  ;;  %v1547_v41 = vadd.f32 %v3075_v6, %v1450_v34  ;;  %v2940_v44 = vpop.f32.mrb[40].mxu0  ;;  %1804 = vmatprep.mubr.bf16.mxu1 %v3592_v1  ;;  %3096 = vmatpush3.bf16.msra.mxu1 %v3902_v19  ;;  %vm1600_vm2 = vcmp.gt.f32.partialorder %v1544_v33, 0.0 }
 0x1ce   : > { %v2941_v45 = vpop.f32.mrb[41].mxu0  ;;  %3089 = vmatprep.subr.bf16.mxu1 %v3904_v20 }
 0x1cf   : > { %v1617_v38 = vmul.f32 0.1, %v1547_v41  ;;  %v2942_v47 = vadd.f32 %v2941_v45, %v2940_v44  ;;  %v2943_v50 = vpop.f32.mrb[42].mxu0  ;;  %vm1601_vm3 = vcmp.gt.f32.partialorder %v1547_v41, 0.0  ;;  %v3986_v53 = vpop.f32.mrb[40].mxu1  ;;  %v1632_v55 = vsel %vm1600_vm2, %v1544_v33, %v1616_v39 }
 0x1d0   : > { %v2944_v51 = vpop.f32.mrb[43].mxu0  ;;  %v1567_v59 = vpop.f32.mrb[41].mxu1 }
 0x1d1   : > { %v2945_v42 = vadd.f32 %v2944_v51, %v2943_v50  ;;  %v1455_v54 = vadd.f32 %v2942_v47, %v3937_v58  ;;  %v1633_v56 = vsel %vm1601_vm3, %v1547_v41, %v1617_v38  ;;  %3097 = vmatpush3.bf16.msra.mxu1 %v3909_v26  ;;  %v3990_v63 = vpop.f32.mrb[42].mxu1 }
 0x1d2   : > { %v1647_v19 = vpack.c.bf16 %v1633_v56, %v1632_v55  ;;  %3090 = vmatprep.subr.bf16.mxu1 %v3912_v29  ;;  %v1570_v5 = vpop.f32.mrb[43].mxu1 }
 0x1d3   : > { %v1552_v20 = vadd.f32 %v1551_v31, %v1455_v54  ;;  %v1458_v0 = vadd.f32 %v2945_v42, %v3942_v62 }
 0x1d4   : > { %1805 = vmatmul.mubr.bf16.gmra.mrb[52].mxu1 %v1647_v19 }
 0x1d5   : > { %v1618_v6 = vmul.f32 0.1, %v1552_v20  ;;  %v1555_v7 = vadd.f32 %v1554_v35, %v1458_v0  ;;  %v2946_v3 = vpop.f32.mrb[44].mxu0  ;;  %1814 = vmatprep.mubr.bf16.mxu1 %v3592_v1  ;;  %3098 = vmatpush3.bf16.msra.mxu1 %v3917_v37  ;;  %vm1602_vm4 = vcmp.gt.f32.partialorder %v1552_v20, 0.0 }
 0x1d6   : > { %v2947_v58 = vpop.f32.mrb[45].mxu0  ;;  %3091 = vmatprep.subr.bf16.mxu1 %v3922_v40 }
 0x1d7   : > { %vm1603_vm5 = vcmp.gt.f32.partialorder %v1555_v7, 0.0  ;;  %v1619_v26 = vmul.f32 0.1, %v1555_v7  ;;  %v2948_v8 = vadd.f32 %v2947_v58, %v2946_v3  ;;  %v2949_v29 = vpop.f32.mrb[46].mxu0  ;;  %v3997_v10 = vpop.f32.mrb[44].mxu1  ;;  %v1634_v12 = vsel %vm1602_vm4, %v1552_v20, %v1618_v6 }
 0x1d8   : > { %v2950_v9 = vpop.f32.mrb[47].mxu0  ;;  %v4000_v15 = vpop.f32.mrb[45].mxu1 }
 0x1d9   : > { %v1463_v62 = vadd.f32 %v2948_v8, %v3951_v14  ;;  %v2951_v11 = vadd.f32 %v2950_v9, %v2949_v29  ;;  %v1635_v13 = vsel %vm1603_vm5, %v1555_v7, %v1619_v26  ;;  %3099 = vmatpush3.bf16.msra.mxu1 %v3927_v46  ;;  %v4003_v17 = vpop.f32.mrb[46].mxu1 }
 0x1da   : > { %v1648_v37 = vpack.c.bf16 %v1635_v13, %v1634_v12  ;;  %3092 = vmatprep.subr.bf16.mxu1 %v3930_v49  ;;  %v4007_v25 = vpop.f32.mrb[47].mxu1 }
 0x1db   : > { %v1560_v40 = vadd.f32 %v3078_v24, %v1463_v62  ;;  %v1466_v21 = vadd.f32 %v2951_v11, %v3953_v18 }
 0x1dc   : > { %1815 = vmatmul.mubr.bf16.gmra.mrb[56].mxu1 %v1648_v37 }
 0x1dd   : > { %v1620_v28 = vmul.f32 0.1, %v1560_v40  ;;  %v1563_v14 = vadd.f32 %v3079_v22, %v1466_v21  ;;  %v2952_v16 = vpop.f32.mrb[48].mxu0  ;;  %1824 = vmatprep.mubr.bf16.mxu1 %v3592_v1  ;;  %3100 = vmatpush3.bf16.msra.mxu1 %v3935_v57  ;;  %vm1604_vm6 = vcmp.gt.f32.partialorder %v1560_v40, 0.0 }
 0x1de   : > { %v2953_v30 = vpop.f32.mrb[49].mxu0  ;;  %3093 = vmatprep.subr.bf16.mxu1 %v3940_v60 }
 0x1df   : > { %v1621_v46 = vmul.f32 0.1, %v1563_v14  ;;  %v2954_v31 = vadd.f32 %v2953_v30, %v2952_v16  ;;  %v2955_v49 = vpop.f32.mrb[50].mxu0  ;;  %vm1605_vm7 = vcmp.gt.f32.partialorder %v1563_v14, 0.0  ;;  %v1636_v33 = vsel %vm1604_vm6, %v1560_v40, %v1620_v28 }
 0x1e0   : > { %v2956_v24 = vpop.f32.mrb[51].mxu0 }
 0x1e1   : > { %v2957_v18 = vadd.f32 %v2956_v24, %v2955_v49  ;;  %v1471_v32 = vadd.f32 %v2954_v31, %v3957_v36  ;;  %v1637_v34 = vsel %vm1605_vm7, %v1563_v14, %v1621_v46  ;;  %3101 = vmatpush3.bf16.msra.mxu1 %v3945_v4  ;;  %v3356_v49 = vld [vmem:[#allocation8 + $0x70] sm:$0xff]  }
 0x1e2   : > { %v1649_v22 = vpack.c.bf16 %v1637_v34, %v1636_v33  ;;  %v3357_v24 = vld [vmem:[#allocation8 + $0x30] sm:$0xff]   ;;  %3004 = vmatprep.subr.bf16.mxu0 %v3356_v49  ;;  %3094 = vmatprep.subr.bf16.mxu1 %v3356_v49 }
 0x1e3   : > { %v1568_v35 = vadd.f32 %v1567_v59, %v1471_v32  ;;  %v1474_v57 = vadd.f32 %v2957_v18, %v3959_v43  ;;  %3005 = vmatpush3.bf16.msra.mxu0 %v3357_v24  ;;  %v1670_v32 = vld [vmem:[%s4250_s4] sm:$0x3] }
 0x1e4   : > { %1825 = vmatmul.mubr.bf16.gmra.mrb[60].mxu1 %v1649_v22 }
 0x1e5   : > { %v1622_v39 = vmul.f32 0.1, %v1568_v35  ;;  %v1571_v41 = vadd.f32 %v1570_v5, %v1474_v57  ;;  %v2958_v60 = vpop.f32.mrb[52].mxu0  ;;  %1834 = vmatprep.mubr.bf16.mxu1 %v3592_v1  ;;  %vm1606_vm8 = vcmp.gt.f32.partialorder %v1568_v35, 0.0  ;;  %3102 = vmatpush3.bf16.msra.mxu1 %v3357_v24 }
 0x1e6   : > { %v2959_v44 = vpop.f32.mrb[53].mxu0 }
 0x1e7   : > { %vm1607_vm9 = vcmp.gt.f32.partialorder %v1571_v41, 0.0  ;;  %v1623_v45 = vmul.f32 0.1, %v1571_v41  ;;  %v2960_v38 = vadd.f32 %v2959_v44, %v2958_v60  ;;  %v2961_v36 = vpop.f32.mrb[54].mxu0  ;;  %v1638_v51 = vsel %vm1606_vm8, %v1568_v35, %v1622_v39 }
 0x1e8   : > { %v2962_v47 = vpop.f32.mrb[55].mxu0 }
 0x1e9   : > { %v1479_v50 = vadd.f32 %v2960_v38, %v3963_v61  ;;  %v2963_v4 = vadd.f32 %v2962_v47, %v2961_v36  ;;  %v1639_v42 = vsel %vm1607_vm9, %v1571_v41, %v1623_v45 }
 0x1ea   : > { %v1650_v54 = vpack.c.bf16 %v1639_v42, %v1638_v51 }
 0x1eb   : > { %v1576_v43 = vadd.f32 %v3986_v53, %v1479_v50  ;;  %v1482_v55 = vadd.f32 %v2963_v4, %v3965_v2 }
 0x1ec   : > { %1835 = vmatmul.mubr.bf16.gmra.mrb[64].mxu1 %v1650_v54 }
 0x1ed   : > { %v1624_v56 = vmul.f32 0.1, %v1576_v43  ;;  %v1579_v59 = vadd.f32 %v3990_v63, %v1482_v55  ;;  %v2964_v19 = vpop.f32.mrb[56].mxu0  ;;  %1844 = vmatprep.mubr.bf16.mxu1 %v3592_v1  ;;  %vm1608_vm10 = vcmp.gt.f32.partialorder %v1576_v43, 0.0 }
 0x1ee   : > { %v2965_v20 = vpop.f32.mrb[57].mxu0 }
 0x1ef   : > { %v1625_v0 = vmul.f32 0.1, %v1579_v59  ;;  %v2966_v5 = vadd.f32 %v2965_v20, %v2964_v19  ;;  %v2967_v61 = vpop.f32.mrb[58].mxu0  ;;  %vm1609_vm11 = vcmp.gt.f32.partialorder %v1579_v59, 0.0  ;;  %v1640_v53 = vsel %vm1608_vm10, %v1576_v43, %v1624_v56 }
 0x1f0   : > { %v2968_v6 = vpop.f32.mrb[59].mxu0 }
 0x1f1   : > { %v2969_v7 = vadd.f32 %v2968_v6, %v2967_v61  ;;  %v1487_v3 = vadd.f32 %v2966_v5, %v3969_v23  ;;  %v1641_v58 = vsel %vm1609_vm11, %v1579_v59, %v1625_v0 }
 0x1f2   : > { %v1651_v2 = vpack.c.bf16 %v1641_v58, %v1640_v53 }
 0x1f3   : > { %v1584_v26 = vadd.f32 %v4000_v15, %v1487_v3  ;;  %v1490_v63 = vadd.f32 %v2969_v7, %v3971_v27 }
 0x1f4   : > { %1845 = vmatmul.mubr.bf16.gmra.mrb[68].mxu1 %v1651_v2 }
 0x1f5   : > { %v1626_v8 = vmul.f32 0.1, %v1584_v26  ;;  %v1587_v29 = vadd.f32 %v4007_v25, %v1490_v63  ;;  %v2970_v9 = vpop.f32.mrb[60].mxu0  ;;  %1854 = vmatprep.mubr.bf16.mxu1 %v3592_v1  ;;  %vm1610_vm12 = vcmp.gt.f32.partialorder %v1584_v26, 0.0 }
 0x1f6   : > { %v2971_v62 = vpop.f32.mrb[61].mxu0 }
 0x1f7   : > { %vm1611_vm13 = vcmp.gt.f32.partialorder %v1587_v29, 0.0  ;;  %v1627_v11 = vmul.f32 0.1, %v1587_v29  ;;  %v2972_v12 = vadd.f32 %v2971_v62, %v2970_v9  ;;  %v2973_v23 = vpop.f32.mrb[62].mxu0  ;;  %v1642_v15 = vsel %vm1610_vm12, %v1584_v26, %v1626_v8 }
 0x1f8   : > { %v2974_v13 = vpop.f32.mrb[63].mxu0 }
 0x1f9   : > { %v1495_v37 = vadd.f32 %v2972_v12, %v3975_v48  ;;  %v2975_v40 = vadd.f32 %v2974_v13, %v2973_v23  ;;  %v1643_v21 = vsel %vm1611_vm13, %v1587_v29, %v1627_v11 }
 0x1fa   : > { %v1652_v27 = vpack.c.bf16 %v1643_v21, %v1642_v15 }
 0x1fb   : > { %v1592_v28 = vadd.f32 %v3997_v10, %v1495_v37  ;;  %v1498_v25 = vadd.f32 %v2975_v40, %v3977_v52  ;;  %v3358_v52 = vld [vmem:[#allocation8 + $0x78] sm:$0xff]  }
 0x1fc   : > { %1855 = vmatmul.mubr.bf16.gmra.mrb[72].mxu1 %v1652_v27  ;;  %v3359_v10 = vld [vmem:[#allocation8 + $0x38] sm:$0xff]   ;;  %3006 = vmatprep.subr.bf16.mxu0 %v3358_v52 }
 0x1fd   : > { %v1628_v14 = vmul.f32 0.1, %v1592_v28  ;;  %v1595_v16 = vadd.f32 %v4003_v17, %v1498_v25  ;;  %1864 = vmatprep.mubr.bf16.mxu1 %v3592_v1  ;;  %vm1612_vm14 = vcmp.gt.f32.partialorder %v1592_v28, 0.0  ;;  %3095 = vmatprep.subr.bf16.mxu1 %v3358_v52  ;;  %v1672_v1 = vlaneseq }
 0x1fe   : > { %3007 = vmatpush3.bf16.msra.mxu0 %v3359_v10  ;;  %3103 = vmatpush3.bf16.msra.mxu1 %v3359_v10 }
 0x1ff   : > { %v1629_v30 = vmul.f32 0.1, %v1595_v16  ;;  %vm1613_vm15 = vcmp.gt.f32.partialorder %v1595_v16, 0.0  ;;  %v1644_v46 = vsel %vm1612_vm14, %v1592_v28, %v1628_v14  ;;  %v1673_v17 = vshrl.u32 %v1672_v1, 7 }
 0x201   : > { %v1645_v31 = vsel %vm1613_vm15, %v1595_v16, %v1629_v30  ;;  %v1674_v18 = vsub.s32 0, %v1673_v17  ;;  %v1678_v33 = vsub.s32 1, %v1673_v17 }
 0x202   : > { %v1653_v48 = vpack.c.bf16 %v1645_v31, %v1644_v46 }
 0x203   : > { %v4034_v34 = vrot.slane %v1670_v32, %v1674_v18  ;;  %v4036_v22 = vrot.slane %v1670_v32, %v1678_v33 }
 0x204   : > { %1865 = vmatmul.mubr.bf16.gmra.mrb[76].mxu1 %v1653_v48 }
 0x29f   : > { %v1796_v35 = vpop.f32.mrb[48].mxu1 }
 0x2a0   : > { %v1797_v57 = vadd.f32 %v1796_v35, %v4034_v34  ;;  %v1798_v39 = vpop.f32.mrb[49].mxu1 }
 0x2a1   : > { %v1799_v41 = vadd.f32 %v1798_v39, %v4036_v22  ;;  %v1800_v60 = vpop.f32.mrb[50].mxu1 }
 0x2a2   : > { %v1907_v44 = vmul.f32 0.1, %v1797_v57  ;;  %v1801_v45 = vadd.f32 %v1800_v60, %v4034_v34  ;;  %v1802_v38 = vpop.f32.mrb[51].mxu1  ;;  %vm1875_vm0 = vcmp.gt.f32.partialorder %v1797_v57, 0.0 }
 0x2a3   : > { %v1908_v36 = vmul.f32 0.1, %v1799_v41  ;;  %v1803_v47 = vadd.f32 %v1802_v38, %v4036_v22  ;;  %vm1876_vm1 = vcmp.gt.f32.partialorder %v1799_v41, 0.0 }
 0x2a4   : > { %vm1877_vm2 = vcmp.gt.f32.partialorder %v1801_v45, 0.0  ;;  %v1909_v50 = vmul.f32 0.1, %v1801_v45  ;;  %v1939_v51 = vsel %vm1875_vm0, %v1797_v57, %v1907_v44 }
 0x2a5   : > { %vm1878_vm3 = vcmp.gt.f32.partialorder %v1803_v47, 0.0  ;;  %v1910_v4 = vmul.f32 0.1, %v1803_v47  ;;  %v1940_v55 = vsel %vm1876_vm1, %v1799_v41, %v1908_v36 }
 0x2a6   : > { %v1941_v42 = vsel %vm1877_vm2, %v1801_v45, %v1909_v50 }
 0x2a7   : > { %v1971_v54 = vpack.c.bf16 %v1941_v42, %v1939_v51  ;;  %v1806_v43 = vpop.f32.mrb[52].mxu1  ;;  %v1942_v56 = vsel %vm1878_vm3, %v1803_v47, %v1910_v4 }
 0x2a8   : > { %v1807_v59 = vadd.f32 %v1806_v43, %v4034_v34  ;;  %v1808_v19 = vpop.f32.mrb[53].mxu1  ;;  %v1972_v20 = vpack.c.bf16 %v1942_v56, %v1940_v55 }
 0x2a9   : > { %v1809_v0 = vadd.f32 %v1808_v19, %v4036_v22  ;;  %v1810_v5 = vpop.f32.mrb[54].mxu1 }
 0x2aa   : > { %v1911_v61 = vmul.f32 0.1, %v1807_v59  ;;  %v1811_v6 = vadd.f32 %v1810_v5, %v4034_v34  ;;  %v1812_v7 = vpop.f32.mrb[55].mxu1  ;;  %2154 = vmatprep.mubr.bf16.mxu0 %v1972_v20  ;;  %vm1879_vm4 = vcmp.gt.f32.partialorder %v1807_v59, 0.0 }
 0x2ab   : > { %v1912_v3 = vmul.f32 0.1, %v1809_v0  ;;  %v1813_v53 = vadd.f32 %v1812_v7, %v4036_v22  ;;  %2155 = vmatmul.mubr.bf16.vlgmr.msra.gmra.mrb[64].mxu0 %v1971_v54  ;;  %vm1880_vm5 = vcmp.gt.f32.partialorder %v1809_v0, 0.0 }
 0x2ac   : > { %vm1881_vm6 = vcmp.gt.f32.partialorder %v1811_v6, 0.0  ;;  %v1913_v58 = vmul.f32 0.1, %v1811_v6  ;;  %v1943_v26 = vsel %vm1879_vm4, %v1807_v59, %v1911_v61 }
 0x2ad   : > { %vm1882_vm7 = vcmp.gt.f32.partialorder %v1813_v53, 0.0  ;;  %v1914_v2 = vmul.f32 0.1, %v1813_v53  ;;  %v1944_v29 = vsel %vm1880_vm5, %v1809_v0, %v1912_v3 }
 0x2ae   : > { %v1945_v63 = vsel %vm1881_vm6, %v1811_v6, %v1913_v58 }
 0x2af   : > { %v1816_v8 = vpop.f32.mrb[56].mxu1  ;;  %v1946_v9 = vsel %vm1882_vm7, %v1813_v53, %v1914_v2  ;;  %v1973_v62 = vpack.c.bf16 %v1945_v63, %v1943_v26 }
 0x2b0   : > { %v1817_v11 = vadd.f32 %v1816_v8, %v4034_v34  ;;  %v1818_v12 = vpop.f32.mrb[57].mxu1  ;;  %v1974_v23 = vpack.c.bf16 %v1946_v9, %v1944_v29 }
 0x2b1   : > { %v1819_v13 = vadd.f32 %v1818_v12, %v4036_v22  ;;  %v1820_v37 = vpop.f32.mrb[58].mxu1 }
 0x2b2   : > { %v1915_v40 = vmul.f32 0.1, %v1817_v11  ;;  %v1821_v15 = vadd.f32 %v1820_v37, %v4034_v34  ;;  %v1822_v21 = vpop.f32.mrb[59].mxu1  ;;  %2162 = vmatprep.mubr.bf16.mxu0 %v1974_v23  ;;  %vm1883_vm8 = vcmp.gt.f32.partialorder %v1817_v11, 0.0 }
 0x2b3   : > { %v1916_v27 = vmul.f32 0.1, %v1819_v13  ;;  %v1823_v28 = vadd.f32 %v1822_v21, %v4036_v22  ;;  %2163 = vmatmul.mubr.bf16.gmra.mrb[68].mxu0 %v1973_v62  ;;  %vm1884_vm9 = vcmp.gt.f32.partialorder %v1819_v13, 0.0 }
 0x2b4   : > { %vm1885_vm10 = vcmp.gt.f32.partialorder %v1821_v15, 0.0  ;;  %v1917_v25 = vmul.f32 0.1, %v1821_v15  ;;  %v1947_v16 = vsel %vm1883_vm8, %v1817_v11, %v1915_v40 }
 0x2b5   : > { %vm1886_vm11 = vcmp.gt.f32.partialorder %v1823_v28, 0.0  ;;  %v1918_v14 = vmul.f32 0.1, %v1823_v28  ;;  %v1948_v31 = vsel %vm1884_vm9, %v1819_v13, %v1916_v27 }
 0x2b6   : > { %v1949_v30 = vsel %vm1885_vm10, %v1821_v15, %v1917_v25 }
 0x2b7   : > { %v1826_v46 = vpop.f32.mrb[60].mxu1  ;;  %v1950_v48 = vsel %vm1886_vm11, %v1823_v28, %v1918_v14  ;;  %v1975_v49 = vpack.c.bf16 %v1949_v30, %v1947_v16 }
 0x2b8   : > { %v1827_v24 = vadd.f32 %v1826_v46, %v4034_v34  ;;  %v1828_v52 = vpop.f32.mrb[61].mxu1  ;;  %v1976_v10 = vpack.c.bf16 %v1950_v48, %v1948_v31 }
 0x2b9   : > { %v1829_v1 = vadd.f32 %v1828_v52, %v4036_v22  ;;  %v1830_v17 = vpop.f32.mrb[62].mxu1 }
 0x2ba   : > { %v1919_v18 = vmul.f32 0.1, %v1827_v24  ;;  %v1831_v32 = vadd.f32 %v1830_v17, %v4034_v34  ;;  %v1832_v33 = vpop.f32.mrb[63].mxu1  ;;  %2170 = vmatprep.mubr.bf16.mxu0 %v1976_v10  ;;  %vm1887_vm12 = vcmp.gt.f32.partialorder %v1827_v24, 0.0 }
 0x2bb   : > { %v1920_v35 = vmul.f32 0.1, %v1829_v1  ;;  %v1833_v57 = vadd.f32 %v1832_v33, %v4036_v22  ;;  %2171 = vmatmul.mubr.bf16.gmra.mrb[72].mxu0 %v1975_v49  ;;  %vm1888_vm13 = vcmp.gt.f32.partialorder %v1829_v1, 0.0 }
 0x2bc   : > { %vm1889_vm14 = vcmp.gt.f32.partialorder %v1831_v32, 0.0  ;;  %v1921_v39 = vmul.f32 0.1, %v1831_v32  ;;  %v1951_v60 = vsel %vm1887_vm12, %v1827_v24, %v1919_v18 }
 0x2bd   : > { %vm1890_vm15 = vcmp.gt.f32.partialorder %v1833_v57, 0.0  ;;  %v1922_v41 = vmul.f32 0.1, %v1833_v57  ;;  %v1952_v38 = vsel %vm1888_vm13, %v1829_v1, %v1920_v35 }
 0x2be   : > { %v1953_v44 = vsel %vm1889_vm14, %v1831_v32, %v1921_v39 }
 0x2bf   : > { %v1836_v45 = vpop.f32.mrb[64].mxu1  ;;  %v1954_v36 = vsel %vm1890_vm15, %v1833_v57, %v1922_v41  ;;  %v1977_v47 = vpack.c.bf16 %v1953_v44, %v1951_v60 }
 0x2c0   : > { %v1837_v50 = vadd.f32 %v1836_v45, %v4034_v34  ;;  %v1838_v4 = vpop.f32.mrb[65].mxu1  ;;  %v1978_v51 = vpack.c.bf16 %v1954_v36, %v1952_v38 }
 0x2c1   : > { %v1839_v42 = vadd.f32 %v1838_v4, %v4036_v22  ;;  %v1840_v54 = vpop.f32.mrb[66].mxu1 }
 0x2c2   : > { %v1923_v43 = vmul.f32 0.1, %v1837_v50  ;;  %v1841_v55 = vadd.f32 %v1840_v54, %v4034_v34  ;;  %v1842_v56 = vpop.f32.mrb[67].mxu1  ;;  %2178 = vmatprep.mubr.bf16.mxu0 %v1978_v51  ;;  %vm1891_vm0 = vcmp.gt.f32.partialorder %v1837_v50, 0.0 }
 0x2c3   : > { %v1924_v59 = vmul.f32 0.1, %v1839_v42  ;;  %v1843_v19 = vadd.f32 %v1842_v56, %v4036_v22  ;;  %2179 = vmatmul.mubr.bf16.gmra.mrb[76].mxu0 %v1977_v47  ;;  %vm1892_vm1 = vcmp.gt.f32.partialorder %v1839_v42, 0.0 }
 0x2c4   : > { %vm1893_vm2 = vcmp.gt.f32.partialorder %v1841_v55, 0.0  ;;  %v1925_v20 = vmul.f32 0.1, %v1841_v55  ;;  %v1955_v5 = vsel %vm1891_vm0, %v1837_v50, %v1923_v43 }
 0x2c5   : > { %vm1894_vm3 = vcmp.gt.f32.partialorder %v1843_v19, 0.0  ;;  %v1926_v0 = vmul.f32 0.1, %v1843_v19  ;;  %v1956_v7 = vsel %vm1892_vm1, %v1839_v42, %v1924_v59 }
 0x2c6   : > { %v1957_v61 = vsel %vm1893_vm2, %v1841_v55, %v1925_v20  ;;  %v4073_v20 = vld [vmem:[%s4252_s6] ss:$0 sm:$0xff] }
 0x2c7   : > { %v1846_v6 = vpop.f32.mrb[68].mxu1  ;;  %v1958_v3 = vsel %vm1894_vm3, %v1843_v19, %v1926_v0  ;;  %v1979_v53 = vpack.c.bf16 %v1957_v61, %v1955_v5 }
 0x2c8   : > { %v1847_v58 = vadd.f32 %v1846_v6, %v4034_v34  ;;  %v1848_v2 = vpop.f32.mrb[69].mxu1  ;;  %v1980_v26 = vpack.c.bf16 %v1958_v3, %v1956_v7 }
 0x2c9   : > { %v1849_v63 = vadd.f32 %v1848_v2, %v4036_v22  ;;  %v1850_v8 = vpop.f32.mrb[70].mxu1 }
 0x2ca   : > { %v1927_v29 = vmul.f32 0.1, %v1847_v58  ;;  %v1851_v9 = vadd.f32 %v1850_v8, %v4034_v34  ;;  %v1852_v62 = vpop.f32.mrb[71].mxu1  ;;  %2186 = vmatprep.mubr.bf16.mxu0 %v1980_v26  ;;  %vm1895_vm4 = vcmp.gt.f32.partialorder %v1847_v58, 0.0 }
 0x2cb   : > { %v1928_v11 = vmul.f32 0.1, %v1849_v63  ;;  %v1853_v12 = vadd.f32 %v1852_v62, %v4036_v22  ;;  %2187 = vmatmul.mubr.bf16.gmra.mrb[80].mxu0 %v1979_v53  ;;  %vm1896_vm5 = vcmp.gt.f32.partialorder %v1849_v63, 0.0 }
 0x2cc   : > { %vm1897_vm6 = vcmp.gt.f32.partialorder %v1851_v9, 0.0  ;;  %v1929_v23 = vmul.f32 0.1, %v1851_v9  ;;  %v1959_v37 = vsel %vm1895_vm4, %v1847_v58, %v1927_v29  ;;  %v4080_v58 = vld [vmem:[%s4253_s7] ss:$0 sm:$0xff] }
 0x2cd   : > { %vm1898_vm7 = vcmp.gt.f32.partialorder %v1853_v12, 0.0  ;;  %v1930_v13 = vmul.f32 0.1, %v1853_v12  ;;  %v1960_v21 = vsel %vm1896_vm5, %v1849_v63, %v1928_v11 }
 0x2ce   : > { %v1961_v40 = vsel %vm1897_vm6, %v1851_v9, %v1929_v23 }
 0x2cf   : > { %v1856_v15 = vpop.f32.mrb[72].mxu1  ;;  %v1962_v27 = vsel %vm1898_vm7, %v1853_v12, %v1930_v13  ;;  %v1981_v28 = vpack.c.bf16 %v1961_v40, %v1959_v37 }
 0x2d0   : > { %v1857_v25 = vadd.f32 %v1856_v15, %v4034_v34  ;;  %v1858_v14 = vpop.f32.mrb[73].mxu1  ;;  %v1982_v16 = vpack.c.bf16 %v1962_v27, %v1960_v21 }
 0x2d1   : > { %v1859_v30 = vadd.f32 %v1858_v14, %v4036_v22  ;;  %v1860_v46 = vpop.f32.mrb[74].mxu1 }
 0x2d2   : > { %v1931_v31 = vmul.f32 0.1, %v1857_v25  ;;  %v1861_v48 = vadd.f32 %v1860_v46, %v4034_v34  ;;  %v1862_v49 = vpop.f32.mrb[75].mxu1  ;;  %2194 = vmatprep.mubr.bf16.mxu0 %v1982_v16  ;;  %vm1899_vm8 = vcmp.gt.f32.partialorder %v1857_v25, 0.0 }
 0x2d3   : > { %v1932_v24 = vmul.f32 0.1, %v1859_v30  ;;  %v1863_v52 = vadd.f32 %v1862_v49, %v4036_v22  ;;  %2195 = vmatmul.mubr.bf16.gmra.mrb[84].mxu0 %v1981_v28  ;;  %vm1900_vm9 = vcmp.gt.f32.partialorder %v1859_v30, 0.0 }
 0x2d4   : > { %vm1901_vm10 = vcmp.gt.f32.partialorder %v1861_v48, 0.0  ;;  %v1933_v10 = vmul.f32 0.1, %v1861_v48  ;;  %v1963_v17 = vsel %vm1899_vm8, %v1857_v25, %v1931_v31 }
 0x2d5   : > { %vm1902_vm11 = vcmp.gt.f32.partialorder %v1863_v52, 0.0  ;;  %v1934_v1 = vmul.f32 0.1, %v1863_v52  ;;  %v1964_v35 = vsel %vm1900_vm9, %v1859_v30, %v1932_v24 }
 0x2d6   : > { %v1965_v18 = vsel %vm1901_vm10, %v1861_v48, %v1933_v10 }
 0x2d7   : > { %v1983_v32 = vpack.c.bf16 %v1965_v18, %v1963_v17  ;;  %v1866_v33 = vpop.f32.mrb[76].mxu1  ;;  %v1966_v57 = vsel %vm1902_vm11, %v1863_v52, %v1934_v1 }
 0x2d8   : > { %v1867_v39 = vadd.f32 %v1866_v33, %v4034_v34  ;;  %v1868_v41 = vpop.f32.mrb[77].mxu1  ;;  %v1984_v60 = vpack.c.bf16 %v1966_v57, %v1964_v35 }
 0x2d9   : > { %v1869_v44 = vadd.f32 %v1868_v41, %v4036_v22  ;;  %v1870_v45 = vpop.f32.mrb[78].mxu1 }
 0x2da   : > { %v1935_v38 = vmul.f32 0.1, %v1867_v39  ;;  %v1871_v36 = vadd.f32 %v1870_v45, %v4034_v34  ;;  %v1872_v47 = vpop.f32.mrb[79].mxu1  ;;  %2202 = vmatprep.mubr.bf16.mxu1 %v1984_v60  ;;  %vm1903_vm12 = vcmp.gt.f32.partialorder %v1867_v39, 0.0 }
 0x2db   : > { %v1936_v50 = vmul.f32 0.1, %v1869_v44  ;;  %v1873_v4 = vadd.f32 %v1872_v47, %v4036_v22  ;;  %2203 = vmatmul.mubr.bf16.vlgmr.msra.gmra.mrb[80].mxu1 %v1983_v32  ;;  %vm1904_vm13 = vcmp.gt.f32.partialorder %v1869_v44, 0.0 }
 0x2dc   : > { %vm1905_vm14 = vcmp.gt.f32.partialorder %v1871_v36, 0.0  ;;  %v1937_v51 = vmul.f32 0.1, %v1871_v36  ;;  %v1967_v54 = vsel %vm1903_vm12, %v1867_v39, %v1935_v38 }
 0x2dd   : > { %vm1906_vm15 = vcmp.gt.f32.partialorder %v1873_v4, 0.0  ;;  %v1938_v42 = vmul.f32 0.1, %v1873_v4  ;;  %v1968_v55 = vsel %vm1904_vm13, %v1869_v44, %v1936_v50 }
 0x2de   : > { %v1969_v43 = vsel %vm1905_vm14, %v1871_v36, %v1937_v51 }
 0x2df   : > { %v1970_v56 = vsel %vm1906_vm15, %v1873_v4, %v1938_v42  ;;  %v1985_v59 = vpack.c.bf16 %v1969_v43, %v1967_v54 }
 0x2e0   : > { %v1986_v19 = vpack.c.bf16 %v1970_v56, %v1968_v55 }
 0x2e2   : > { %2210 = vmatprep.mubr.bf16.mxu1 %v1986_v19 }
 0x2e3   : > { %2211 = vmatmul.mubr.bf16.gmra.mrb[84].mxu1 %v1985_v59 }
 0x37e   : > { %v3008_v34 = vpop.f32.mrb[64].mxu0 }
 0x37f   : > { %v3009_v22 = vpop.f32.mrb[65].mxu0 }
 0x380   : > { %v3010_v0 = vadd.f32 %v3009_v22, %v3008_v34  ;;  %v3011_v5 = vpop.f32.mrb[66].mxu0 }
 0x381   : > { %v3012_v61 = vpop.f32.mrb[67].mxu0 }
 0x382   : > { %v2157_v6 = vadd.f32 %v3010_v0, %v4073_v20  ;;  %v3013_v7 = vadd.f32 %v3012_v61, %v3011_v5 }
 0x384   : > { %v2160_v3 = vadd.f32 %v3013_v7, %v4073_v20  ;;  %vm2219_vm0 = vcmp.gt.f32.partialorder %v2157_v6, 0.0  ;;  %v2235_v53 = vmul.f32 0.1, %v2157_v6 }
 0x386   : > { %v3014_v2 = vpop.f32.mrb[68].mxu0  ;;  %v2251_v26 = vsel %vm2219_vm0, %v2157_v6, %v2235_v53  ;;  %vm2220_vm1 = vcmp.gt.f32.partialorder %v2160_v3, 0.0  ;;  %v2236_v63 = vmul.f32 0.1, %v2160_v3  ;;  %vm2505_vm0 = vcmask 7168  }
 0x387   : > { %v3015_v8 = vpop.f32.mrb[69].mxu0  ;;  %v2274_v29 = vmul.f32 %v4080_v58, %v2251_v26 }
 0x388   : > { %v3016_v9 = vadd.f32 %v3015_v8, %v3014_v2  ;;  %v3017_v62 = vpop.f32.mrb[70].mxu0  ;;  %v2252_v11 = vsel %vm2220_vm1, %v2160_v3, %v2236_v63 }
 0x389   : > { %v3018_v12 = vpop.f32.mrb[71].mxu0  ;;  %2290 = vadd.xlane.f32.xlu0 %v2274_v29  ;;  %v2275_v37 = vmul.f32 %v4080_v58, %v2252_v11 }
 0x38a   : > { %v2165_v23 = vadd.f32 %v3016_v9, %v4073_v20  ;;  %v3019_v13 = vadd.f32 %v3018_v12, %v3017_v62 }
 0x38c   : > { %v2168_v40 = vadd.f32 %v3019_v13, %v4073_v20  ;;  %vm2221_vm2 = vcmp.gt.f32.partialorder %v2165_v23, 0.0  ;;  %v2237_v15 = vmul.f32 0.1, %v2165_v23 }
 0x38d   : > { %2292 = vadd.xlane.f32.xlu0 %v2275_v37 }
 0x38e   : > { %v3020_v21 = vpop.f32.mrb[72].mxu0  ;;  %v2253_v27 = vsel %vm2221_vm2, %v2165_v23, %v2237_v15  ;;  %vm2222_vm3 = vcmp.gt.f32.partialorder %v2168_v40, 0.0  ;;  %v2238_v28 = vmul.f32 0.1, %v2168_v40 }
 0x38f   : > { %v3021_v25 = vpop.f32.mrb[73].mxu0  ;;  %v2276_v14 = vmul.f32 %v4080_v58, %v2253_v27 }
 0x390   : > { %v3022_v16 = vadd.f32 %v3021_v25, %v3020_v21  ;;  %v3023_v30 = vpop.f32.mrb[74].mxu0  ;;  %v2254_v46 = vsel %vm2222_vm3, %v2168_v40, %v2238_v28 }
 0x391   : > { %v3024_v31 = vpop.f32.mrb[75].mxu0  ;;  %2294 = vadd.xlane.f32.xlu1 %v2276_v14  ;;  %v2277_v24 = vmul.f32 %v4080_v58, %v2254_v46 }
 0x392   : > { %v2173_v48 = vadd.f32 %v3022_v16, %v4073_v20  ;;  %v3025_v49 = vadd.f32 %v3024_v31, %v3023_v30 }
 0x394   : > { %v2176_v52 = vadd.f32 %v3025_v49, %v4073_v20  ;;  %vm2223_vm4 = vcmp.gt.f32.partialorder %v2173_v48, 0.0  ;;  %v2239_v10 = vmul.f32 0.1, %v2173_v48 }
 0x395   : > { %2296 = vadd.xlane.f32.xlu1 %v2277_v24 }
 0x396   : > { %v3026_v1 = vpop.f32.mrb[76].mxu0  ;;  %v2255_v17 = vsel %vm2223_vm4, %v2173_v48, %v2239_v10  ;;  %vm2224_vm5 = vcmp.gt.f32.partialorder %v2176_v52, 0.0  ;;  %v2240_v18 = vmul.f32 0.1, %v2176_v52 }
 0x397   : > { %v3027_v32 = vpop.f32.mrb[77].mxu0  ;;  %v2278_v33 = vmul.f32 %v4080_v58, %v2255_v17 }
 0x398   : > { %v3028_v35 = vadd.f32 %v3027_v32, %v3026_v1  ;;  %v3029_v57 = vpop.f32.mrb[78].mxu0  ;;  %v2256_v39 = vsel %vm2224_vm5, %v2176_v52, %v2240_v18 }
 0x399   : > { %v3030_v41 = vpop.f32.mrb[79].mxu0  ;;  %2298 = vadd.xlane.f32.xlu0 %v2278_v33  ;;  %v2279_v60 = vmul.f32 %v4080_v58, %v2256_v39 }
 0x39a   : > { %v2181_v44 = vadd.f32 %v3028_v35, %v4073_v20  ;;  %v3031_v45 = vadd.f32 %v3030_v41, %v3029_v57 }
 0x39b   : > { %2300 = vadd.xlane.f32.xlu1 %v2279_v60 }
 0x39c   : > { %v2184_v38 = vadd.f32 %v3031_v45, %v4073_v20  ;;  %vm2225_vm6 = vcmp.gt.f32.partialorder %v2181_v44, 0.0  ;;  %v2241_v36 = vmul.f32 0.1, %v2181_v44 }
 0x39e   : > { %v3032_v47 = vpop.f32.mrb[80].mxu0  ;;  %v2257_v50 = vsel %vm2225_vm6, %v2181_v44, %v2241_v36  ;;  %vm2226_vm7 = vcmp.gt.f32.partialorder %v2184_v38, 0.0  ;;  %v2242_v4 = vmul.f32 0.1, %v2184_v38  ;;  %v4112_v36 = vld [vmem:[#allocation2] ss:$0 sm:$0xff] }
 0x39f   : > { %v3033_v51 = vpop.f32.mrb[81].mxu0  ;;  %v2280_v42 = vmul.f32 %v4080_v58, %v2257_v50 }
 0x3a0   : > { %v3034_v54 = vadd.f32 %v3033_v51, %v3032_v47  ;;  %v3035_v43 = vpop.f32.mrb[82].mxu0  ;;  %v2258_v55 = vsel %vm2226_vm7, %v2184_v38, %v2242_v4 }
 0x3a1   : > { %v3036_v56 = vpop.f32.mrb[83].mxu0  ;;  %2302 = vadd.xlane.f32.xlu0 %v2280_v42  ;;  %v2281_v59 = vmul.f32 %v4080_v58, %v2258_v55 }
 0x3a2   : > { %v2189_v19 = vadd.f32 %v3034_v54, %v4073_v20  ;;  %v3037_v34 = vadd.f32 %v3036_v56, %v3035_v43 }
 0x3a3   : > { %2304 = vadd.xlane.f32.xlu1 %v2281_v59 }
 0x3a4   : > { %v2192_v22 = vadd.f32 %v3037_v34, %v4073_v20  ;;  %vm2227_vm8 = vcmp.gt.f32.partialorder %v2189_v19, 0.0  ;;  %v2243_v0 = vmul.f32 0.1, %v2189_v19 }
 0x3a6   : > { %v3038_v5 = vpop.f32.mrb[84].mxu0  ;;  %v2259_v61 = vsel %vm2227_vm8, %v2189_v19, %v2243_v0  ;;  %vm2228_vm9 = vcmp.gt.f32.partialorder %v2192_v22, 0.0  ;;  %v2244_v6 = vmul.f32 0.1, %v2192_v22 }
 0x3a7   : > { %v3039_v7 = vpop.f32.mrb[85].mxu0  ;;  %v2282_v3 = vmul.f32 %v4080_v58, %v2259_v61 }
 0x3a8   : > { %v3040_v53 = vadd.f32 %v3039_v7, %v3038_v5  ;;  %v3041_v2 = vpop.f32.mrb[86].mxu0  ;;  %v2260_v26 = vsel %vm2228_vm9, %v2192_v22, %v2244_v6 }
 0x3a9   : > { %v3042_v63 = vpop.f32.mrb[87].mxu0  ;;  %2306 = vadd.xlane.f32.xlu0 %v2282_v3  ;;  %v2283_v8 = vmul.f32 %v4080_v58, %v2260_v26 }
 0x3aa   : > { %v2197_v29 = vadd.f32 %v3040_v53, %v4073_v20  ;;  %v3043_v9 = vadd.f32 %v3042_v63, %v3041_v2 }
 0x3ab   : > { %2308 = vadd.xlane.f32.xlu1 %v2283_v8 }
 0x3ac   : > { %v2200_v62 = vadd.f32 %v3043_v9, %v4073_v20  ;;  %vm2229_vm10 = vcmp.gt.f32.partialorder %v2197_v29, 0.0  ;;  %v2245_v11 = vmul.f32 0.1, %v2197_v29 }
 0x3ae   : > { %v3044_v12 = vpop.f32.mrb[80].mxu1  ;;  %v2261_v23 = vsel %vm2229_vm10, %v2197_v29, %v2245_v11  ;;  %vm2230_vm11 = vcmp.gt.f32.partialorder %v2200_v62, 0.0  ;;  %v2246_v13 = vmul.f32 0.1, %v2200_v62 }
 0x3af   : > { %v3045_v37 = vpop.f32.mrb[81].mxu1  ;;  %v2284_v40 = vmul.f32 %v4080_v58, %v2261_v23 }
 0x3b0   : > { %v3046_v15 = vadd.f32 %v3045_v37, %v3044_v12  ;;  %v3047_v21 = vpop.f32.mrb[82].mxu1  ;;  %v2262_v27 = vsel %vm2230_vm11, %v2200_v62, %v2246_v13 }
 0x3b1   : > { %v3048_v28 = vpop.f32.mrb[83].mxu1  ;;  %2310 = vadd.xlane.f32.xlu0 %v2284_v40  ;;  %v2285_v25 = vmul.f32 %v4080_v58, %v2262_v27 }
 0x3b2   : > { %v2205_v14 = vadd.f32 %v3046_v15, %v4073_v20  ;;  %v3049_v16 = vadd.f32 %v3048_v28, %v3047_v21 }
 0x3b3   : > { %2312 = vadd.xlane.f32.xlu1 %v2285_v25 }
 0x3b4   : > { %v2208_v30 = vadd.f32 %v3049_v16, %v4073_v20  ;;  %vm2231_vm12 = vcmp.gt.f32.partialorder %v2205_v14, 0.0  ;;  %v2247_v46 = vmul.f32 0.1, %v2205_v14 }
 0x3b6   : > { %v3050_v31 = vpop.f32.mrb[84].mxu1  ;;  %v2263_v48 = vsel %vm2231_vm12, %v2205_v14, %v2247_v46  ;;  %vm2232_vm13 = vcmp.gt.f32.partialorder %v2208_v30, 0.0  ;;  %v2248_v49 = vmul.f32 0.1, %v2208_v30 }
 0x3b7   : > { %v3051_v24 = vpop.f32.mrb[85].mxu1  ;;  %v2286_v52 = vmul.f32 %v4080_v58, %v2263_v48 }
 0x3b8   : > { %v3052_v10 = vadd.f32 %v3051_v24, %v3050_v31  ;;  %v3053_v1 = vpop.f32.mrb[86].mxu1  ;;  %v2264_v17 = vsel %vm2232_vm13, %v2208_v30, %v2248_v49 }
 0x3b9   : > { %v3054_v18 = vpop.f32.mrb[87].mxu1  ;;  %2314 = vadd.xlane.f32.xlu0 %v2286_v52  ;;  %v2287_v32 = vmul.f32 %v4080_v58, %v2264_v17 }
 0x3ba   : > { %v2213_v33 = vadd.f32 %v3052_v10, %v4073_v20  ;;  %v3055_v35 = vadd.f32 %v3054_v18, %v3053_v1 }
 0x3bb   : > { %2316 = vadd.xlane.f32.xlu1 %v2287_v32 }
 0x3bc   : > { %v2216_v57 = vadd.f32 %v3055_v35, %v4073_v20  ;;  %vm2233_vm14 = vcmp.gt.f32.partialorder %v2213_v33, 0.0  ;;  %v2249_v39 = vmul.f32 0.1, %v2213_v33 }
 0x3be   : > { %v2265_v41 = vsel %vm2233_vm14, %v2213_v33, %v2249_v39  ;;  %vm2234_vm15 = vcmp.gt.f32.partialorder %v2216_v57, 0.0  ;;  %v2250_v60 = vmul.f32 0.1, %v2216_v57 }
 0x3bf   : > { %v2288_v44 = vmul.f32 %v4080_v58, %v2265_v41 }
 0x3c0   : > { %v2266_v45 = vsel %vm2234_vm15, %v2216_v57, %v2250_v60 }
 0x3c1   : > { %2318 = vadd.xlane.f32.xlu0 %v2288_v44  ;;  %v2289_v38 = vmul.f32 %v4080_v58, %v2266_v45 }
 0x3c3   : > { %2320 = vadd.xlane.f32.xlu1 %v2289_v38 }
 0x416   : > { %v2291_v47 = vpop.xlane.xlu0 %2290 }
 0x417   : > { %v4115_v50 = vadd.f32 %v4112_v36, %v2291_v47 }
 0x419   : > { %v2345_v20 = vand.u32 2147483647, %v4115_v50  ;;  %vm2425_vm1 = vcmp.ge.f32.partialorder %v4115_v50, 0.0 }
 0x41a   : > { %v2293_v4 = vpop.xlane.xlu0 %2292 }
 0x41b   : > { %v2361_v51 = vsub.f32 0.0, %v2345_v20  ;;  %v4119_v42 = vadd.f32 %v4112_v36, %v2293_v4 }
 0x41d   : > { %v2377_v54 = vmul.f32 1.442695, %v2361_v51  ;;  %v2346_v43 = vand.u32 2147483647, %v4119_v42  ;;  %vm2426_vm2 = vcmp.ge.f32.partialorder %v4119_v42, 0.0 }
 0x41e   : > { %v2295_v55 = vpop.xlane.xlu1 %2294 }
 0x41f   : > { %3360 = vpow2.f32 %v2377_v54  ;;  %v2362_v58 = vsub.f32 0.0, %v2346_v43  ;;  %v4123_v56 = vadd.f32 %v4112_v36, %v2295_v55 }
 0x421   : > { %v2379_v59 = vmul.f32 1.442695, %v2362_v58  ;;  %v2347_v19 = vand.u32 2147483647, %v4123_v56  ;;  %vm2427_vm3 = vcmp.ge.f32.partialorder %v4123_v56, 0.0 }
 0x422   : > { %v2297_v34 = vpop.xlane.xlu1 %2296 }
 0x423   : > { %3362 = vpow2.f32 %v2379_v59  ;;  %v2363_v22 = vsub.f32 0.0, %v2347_v19  ;;  %v4127_v0 = vadd.f32 %v4112_v36, %v2297_v34 }
 0x425   : > { %v2381_v5 = vmul.f32 1.442695, %v2363_v22  ;;  %v2348_v61 = vand.u32 2147483647, %v4127_v0  ;;  %vm2428_vm4 = vcmp.ge.f32.partialorder %v4127_v0, 0.0 }
 0x426   : > { %v2299_v6 = vpop.xlane.xlu0 %2298 }
 0x427   : > { %3364 = vpow2.f32 %v2381_v5  ;;  %v2364_v7 = vsub.f32 0.0, %v2348_v61  ;;  %v4131_v3 = vadd.f32 %v4112_v36, %v2299_v6 }
 0x428   : > { %v2301_v53 = vpop.xlane.xlu1 %2300 }
 0x429   : > { %v3361_v2 = vpop.eup %3360  ;;  %v2383_v26 = vmul.f32 1.442695, %v2364_v7  ;;  %v2349_v63 = vand.u32 2147483647, %v4131_v3  ;;  %v4137_v8 = vadd.f32 %v4112_v36, %v2301_v53  ;;  %vm2429_vm5 = vcmp.ge.f32.partialorder %v4131_v3, 0.0 }
 0x42a   : > { %v2409_v29 = vadd.f32 1.0, %v3361_v2 }
 0x42b   : > { %3366 = vpow2.f32 %v2383_v26  ;;  %v2365_v9 = vsub.f32 0.0, %v2349_v63  ;;  %v2350_v62 = vand.u32 2147483647, %v4137_v8  ;;  %vm2430_vm6 = vcmp.ge.f32.partialorder %v4137_v8, 0.0 }
 0x42c   : > { %3368 = vrcp.f32 %v2409_v29 }
 0x42d   : > { %v3363_v11 = vpop.eup %3362  ;;  %v2385_v12 = vmul.f32 1.442695, %v2365_v9  ;;  %v2366_v23 = vsub.f32 0.0, %v2350_v62 }
 0x42e   : > { %v2410_v13 = vadd.f32 1.0, %v3363_v11  ;;  %v2303_v37 = vpop.xlane.xlu0 %2302 }
 0x42f   : > { %3370 = vpow2.f32 %v2385_v12  ;;  %v2387_v40 = vmul.f32 1.442695, %v2366_v23  ;;  %v4141_v15 = vadd.f32 %v4112_v36, %v2303_v37 }
 0x430   : > { %3372 = vrcp.f32 %v2410_v13  ;;  %v2305_v21 = vpop.xlane.xlu1 %2304 }
 0x431   : > { %v3365_v27 = vpop.eup %3364  ;;  %3374 = vpow2.f32 %v2387_v40  ;;  %v2351_v28 = vand.u32 2147483647, %v4141_v15  ;;  %v4145_v25 = vadd.f32 %v4112_v36, %v2305_v21  ;;  %vm2431_vm7 = vcmp.ge.f32.partialorder %v4141_v15, 0.0 }
 0x432   : > { %v2411_v14 = vadd.f32 1.0, %v3365_v27 }
 0x433   : > { %v2367_v16 = vsub.f32 0.0, %v2351_v28  ;;  %v2352_v30 = vand.u32 2147483647, %v4145_v25  ;;  %vm2432_vm8 = vcmp.ge.f32.partialorder %v4145_v25, 0.0 }
 0x434   : > { %3376 = vrcp.f32 %v2411_v14 }
 0x435   : > { %v3367_v46 = vpop.eup %3366  ;;  %v2389_v31 = vmul.f32 1.442695, %v2367_v16  ;;  %v2368_v48 = vsub.f32 0.0, %v2352_v30 }
 0x436   : > { %v3369_v49 = vpop.eup %3368  ;;  %v2412_v24 = vadd.f32 1.0, %v3367_v46  ;;  %v2307_v52 = vpop.xlane.xlu0 %2306 }
 0x437   : > { %v2473_v10 = vmul.f32 %v3369_v49, %v3361_v2  ;;  %3378 = vpow2.f32 %v2389_v31  ;;  %v2391_v1 = vmul.f32 1.442695, %v2368_v48  ;;  %v4154_v17 = vadd.f32 %v4112_v36, %v2307_v52 }
 0x438   : > { %3380 = vrcp.f32 %v2412_v24  ;;  %v2309_v18 = vpop.xlane.xlu1 %2308 }
 0x439   : > { %v3371_v32 = vpop.eup %3370  ;;  %v2489_v33 = vsel %vm2425_vm1, %v3369_v49, %v2473_v10  ;;  %3382 = vpow2.f32 %v2391_v1  ;;  %v2353_v35 = vand.u32 2147483647, %v4154_v17  ;;  %v4161_v41 = vadd.f32 %v4112_v36, %v2309_v18 }
 0x43a   : > { %v3373_v57 = vpop.eup %3372  ;;  %2506 = vst.msk [vmem:[%s4151_s19] sm:$0xff] %vm2505_vm0, %v2489_v33  ;;  %v2413_v39 = vadd.f32 1.0, %v3371_v32  ;;  %vm2433_vm9 = vcmp.ge.f32.partialorder %v4154_v17, 0.0 }
 0x43b   : > { %v3375_v60 = vpop.eup %3374  ;;  %v2474_v44 = vmul.f32 %v3373_v57, %v3363_v11  ;;  %v2369_v45 = vsub.f32 0.0, %v2353_v35  ;;  %v2354_v47 = vand.u32 2147483647, %v4161_v41  ;;  %vm2434_vm10 = vcmp.ge.f32.partialorder %v4161_v41, 0.0 }
 0x43c   : > { %3384 = vrcp.f32 %v2413_v39  ;;  %v2414_v38 = vadd.f32 1.0, %v3375_v60 }
 0x43d   : > { %v2490_v50 = vsel %vm2426_vm2, %v3373_v57, %v2474_v44  ;;  %v2393_v20 = vmul.f32 1.442695, %v2369_v45  ;;  %v2370_v51 = vsub.f32 0.0, %v2354_v47 }
 0x43e   : > { %v3377_v4 = vpop.eup %3376  ;;  %2507 = vst.msk [vmem:[%s4151_s19 + $0x8] sm:$0xff] %vm2505_vm0, %v2490_v50  ;;  %3386 = vrcp.f32 %v2414_v38  ;;  %v2311_v54 = vpop.xlane.xlu0 %2310 }
 0x43f   : > { %v2475_v43 = vmul.f32 %v3377_v4, %v3365_v27  ;;  %3388 = vpow2.f32 %v2393_v20  ;;  %v4168_v55 = vadd.f32 %v4112_v36, %v2311_v54  ;;  %v2395_v42 = vmul.f32 1.442695, %v2370_v51 }
 0x440   : > { %v2313_v58 = vpop.xlane.xlu1 %2312 }
 0x441   : > { %v3379_v59 = vpop.eup %3378  ;;  %v2491_v19 = vsel %vm2427_vm3, %v3377_v4, %v2475_v43  ;;  %v2355_v34 = vand.u32 2147483647, %v4168_v55  ;;  %v4173_v22 = vadd.f32 %v4112_v36, %v2313_v58  ;;  %3390 = vpow2.f32 %v2395_v42 }
 0x442   : > { %v3381_v5 = vpop.eup %3380  ;;  %2508 = vst.msk [vmem:[%s4151_s19 + $0x10] sm:$0xff] %vm2505_vm0, %v2491_v19  ;;  %v2415_v61 = vadd.f32 1.0, %v3379_v59  ;;  %vm2435_vm11 = vcmp.ge.f32.partialorder %v4168_v55, 0.0 }
 0x443   : > { %v3383_v6 = vpop.eup %3382  ;;  %v2476_v7 = vmul.f32 %v3381_v5, %v3367_v46  ;;  %v2371_v53 = vsub.f32 0.0, %v2355_v34  ;;  %v2356_v56 = vand.u32 2147483647, %v4173_v22  ;;  %vm2436_vm12 = vcmp.ge.f32.partialorder %v4173_v22, 0.0 }
 0x444   : > { %3392 = vrcp.f32 %v2415_v61  ;;  %v2416_v2 = vadd.f32 1.0, %v3383_v6 }
 0x445   : > { %v2492_v26 = vsel %vm2428_vm4, %v3381_v5, %v2476_v7  ;;  %v2397_v63 = vmul.f32 1.442695, %v2371_v53  ;;  %v2372_v29 = vsub.f32 0.0, %v2356_v56 }
 0x446   : > { %v3385_v9 = vpop.eup %3384  ;;  %2509 = vst.msk [vmem:[%s4151_s19 + $0x18] sm:$0xff] %vm2505_vm0, %v2492_v26  ;;  %3394 = vrcp.f32 %v2416_v2  ;;  %v2315_v62 = vpop.xlane.xlu0 %2314 }
 0x447   : > { %v2477_v11 = vmul.f32 %v3385_v9, %v3371_v32  ;;  %3396 = vpow2.f32 %v2397_v63  ;;  %v2399_v12 = vmul.f32 1.442695, %v2372_v29  ;;  %v4182_v23 = vadd.f32 %v4112_v36, %v2315_v62 }
 0x448   : > { %v3387_v13 = vpop.eup %3386  ;;  %v2317_v0 = vpop.xlane.xlu1 %2316 }
 0x449   : > { %v3389_v37 = vpop.eup %3388  ;;  %v2493_v40 = vsel %vm2429_vm5, %v3385_v9, %v2477_v11  ;;  %v2478_v21 = vmul.f32 %v3387_v13, %v3375_v60  ;;  %3398 = vpow2.f32 %v2399_v12  ;;  %v2357_v27 = vand.u32 2147483647, %v4182_v23 }
 0x44a   : > { %2510 = vst.msk [vmem:[%s4151_s19 + $0x20] sm:$0xff] %vm2505_vm0, %v2493_v40  ;;  %v2417_v28 = vadd.f32 1.0, %v3389_v37  ;;  %v4190_v14 = vadd.f32 %v4112_v36, %v2317_v0  ;;  %vm2437_vm13 = vcmp.ge.f32.partialorder %v4182_v23, 0.0 }
 0x44b   : > { %v2494_v16 = vsel %vm2430_vm6, %v3387_v13, %v2478_v21  ;;  %v2373_v30 = vsub.f32 0.0, %v2357_v27  ;;  %v3391_v46 = vpop.eup %3390 }
 0x44c   : > { %2511 = vst.msk [vmem:[%s4151_s19 + $0x28] sm:$0xff] %vm2505_vm0, %v2494_v16  ;;  %3400 = vrcp.f32 %v2417_v28  ;;  %v2358_v3 = vand.u32 2147483647, %v4190_v14  ;;  %v2418_v31 = vadd.f32 1.0, %v3391_v46  ;;  %vm2438_vm14 = vcmp.ge.f32.partialorder %v4190_v14, 0.0 }
 0x44d   : > { %v2401_v48 = vmul.f32 1.442695, %v2373_v30 }
 0x44e   : > { %v3393_v49 = vpop.eup %3392  ;;  %v2374_v24 = vsub.f32 0.0, %v2358_v3  ;;  %v2319_v52 = vpop.xlane.xlu0 %2318  ;;  %3402 = vrcp.f32 %v2418_v31 }
 0x44f   : > { %v2479_v10 = vmul.f32 %v3393_v49, %v3379_v59  ;;  %v4196_v8 = vadd.f32 %v4112_v36, %v2319_v52  ;;  %3404 = vpow2.f32 %v2401_v48 }
 0x450   : > { %v3395_v1 = vpop.eup %3394  ;;  %v2403_v18 = vmul.f32 1.442695, %v2374_v24  ;;  %v2321_v32 = vpop.xlane.xlu1 %2320 }
 0x451   : > { %v3397_v33 = vpop.eup %3396  ;;  %v2495_v35 = vsel %vm2431_vm7, %v3393_v49, %v2479_v10  ;;  %v2480_v57 = vmul.f32 %v3395_v1, %v3383_v6  ;;  %v2359_v39 = vand.u32 2147483647, %v4196_v8  ;;  %v4204_v44 = vadd.f32 %v4112_v36, %v2321_v32 }
 0x452   : > { %2512 = vst.msk [vmem:[%s4151_s19 + $0x30] sm:$0xff] %vm2505_vm0, %v2495_v35  ;;  %v2419_v60 = vadd.f32 1.0, %v3397_v33  ;;  %3406 = vpow2.f32 %v2403_v18  ;;  %vm2439_vm15 = vcmp.ge.f32.partialorder %v4196_v8, 0.0 }
 0x453   : > { %v3399_v45 = vpop.eup %3398  ;;  %v2496_v15 = vsel %vm2432_vm8, %v3395_v1, %v2480_v57  ;;  %v2375_v38 = vsub.f32 0.0, %v2359_v39  ;;  %v2360_v50 = vand.u32 2147483647, %v4204_v44  ;;  %vm2440_vm1 = vcmp.ge.f32.partialorder %v4204_v44, 0.0 }
 0x454   : > { %2513 = vst.msk [vmem:[%s4151_s19 + $0x38] sm:$0xff] %vm2505_vm0, %v2496_v15  ;;  %3408 = vrcp.f32 %v2419_v60  ;;  %v2420_v47 = vadd.f32 1.0, %v3399_v45 }
 0x455   : > { %v2405_v20 = vmul.f32 1.442695, %v2375_v38  ;;  %v2376_v25 = vsub.f32 0.0, %v2360_v50 }
 0x456   : > { %v3401_v4 = vpop.eup %3400  ;;  %3410 = vrcp.f32 %v2420_v47 }
 0x457   : > { %v2481_v51 = vmul.f32 %v3401_v4, %v3389_v37  ;;  %3412 = vpow2.f32 %v2405_v20  ;;  %v2407_v36 = vmul.f32 1.442695, %v2376_v25 }
 0x458   : > { %v3403_v54 = vpop.eup %3402 }
 0x459   : > { %v2497_v43 = vsel %vm2433_vm9, %v3401_v4, %v2481_v51  ;;  %v3405_v42 = vpop.eup %3404  ;;  %v2482_v58 = vmul.f32 %v3403_v54, %v3391_v46  ;;  %3414 = vpow2.f32 %v2407_v36 }
 0x45a   : > { %2514 = vst.msk [vmem:[%s4151_s19 + $0x40] sm:$0xff] %vm2505_vm0, %v2497_v43  ;;  %v2421_v59 = vadd.f32 1.0, %v3405_v42 }
 0x45b   : > { %v2498_v34 = vsel %vm2434_vm10, %v3403_v54, %v2482_v58 }
 0x45c   : > { %v3407_v19 = vpop.eup %3406  ;;  %2515 = vst.msk [vmem:[%s4151_s19 + $0x48] sm:$0xff] %vm2505_vm0, %v2498_v34  ;;  %3416 = vrcp.f32 %v2421_v59 }
 0x45d   : > { %v2422_v5 = vadd.f32 1.0, %v3407_v19 }
 0x45e   : > { %v3409_v17 = vpop.eup %3408 }
 0x45f   : > { %v2483_v61 = vmul.f32 %v3409_v17, %v3397_v33  ;;  %3418 = vrcp.f32 %v2422_v5 }
 0x460   : > { %v3411_v6 = vpop.eup %3410 }
 0x461   : > { %v3413_v7 = vpop.eup %3412  ;;  %v2499_v53 = vsel %vm2435_vm11, %v3409_v17, %v2483_v61  ;;  %v2484_v56 = vmul.f32 %v3411_v6, %v3399_v45 }
 0x462   : > { %2516 = vst.msk [vmem:[%s4151_s19 + $0x50] sm:$0xff] %vm2505_vm0, %v2499_v53  ;;  %v2423_v41 = vadd.f32 1.0, %v3413_v7 }
 0x463   : > { %v2500_v2 = vsel %vm2436_vm12, %v3411_v6, %v2484_v56  ;;  %v3415_v26 = vpop.eup %3414 }
 0x464   : > { %2517 = vst.msk [vmem:[%s4151_s19 + $0x58] sm:$0xff] %vm2505_vm0, %v2500_v2  ;;  %3420 = vrcp.f32 %v2423_v41  ;;  %v2424_v63 = vadd.f32 1.0, %v3415_v26 }
 0x466   : > { %v3417_v29 = vpop.eup %3416  ;;  %3422 = vrcp.f32 %v2424_v63 }
 0x467   : > { %v2485_v55 = vmul.f32 %v3417_v29, %v3405_v42 }
 0x469   : > { %v3419_v9 = vpop.eup %3418  ;;  %v2501_v62 = vsel %vm2437_vm13, %v3417_v29, %v2485_v55 }
 0x46a   : > { %v2486_v11 = vmul.f32 %v3419_v9, %v3407_v19  ;;  %2518 = vst.msk [vmem:[%s4151_s19 + $0x60] sm:$0xff] %vm2505_vm0, %v2501_v62 }
 0x46c   : > { %v2502_v22 = vsel %vm2438_vm14, %v3419_v9, %v2486_v11 }
 0x46d   : > { %2519 = vst.msk [vmem:[%s4151_s19 + $0x68] sm:$0xff] %vm2505_vm0, %v2502_v22 }
 0x46e   : > { %v3421_v12 = vpop.eup %3420 }
 0x46f   : > { %v2487_v13 = vmul.f32 %v3421_v12, %v3413_v7 }
 0x470   : > { %v3423_v0 = vpop.eup %3422 }
 0x471   : > { %v2503_v37 = vsel %vm2439_vm15, %v3421_v12, %v2487_v13  ;;  %v2488_v40 = vmul.f32 %v3423_v0, %v3415_v26 }
 0x472   : > { %2520 = vst.msk [vmem:[%s4151_s19 + $0x70] sm:$0xff] %vm2505_vm0, %v2503_v37 }
 0x473   : > { %v2504_v23 = vsel %vm2440_vm1, %v3423_v0, %v2488_v40 }
 0x474   : > { %2521 = vst.msk [vmem:[%s4151_s19 + $0x78] sm:$0xff] %vm2505_vm0, %v2504_v23 }
 0x475 PF: > { %p23_p6 = scmp.ge.s32.totalorder %s3745_s29, 4   ;;  %s4277_s11 = smov %s3572_s12 }
 0x476   : > { %s4278_s12 = smov %s3576_s13  ;;  %s4279_s13 = smov %s3776_s20 }
 0x477   : > { %s4280_s14 = smov %s3745_s29  ;;  %25 = sbr.rel (!%p23_p6) target bundleno = 8 (0x8), region = 108 }
 0x47e   :  { %2544 = vsyncpa [#allocation4], 1 }
 0x47f   :  { %2546 = vsyncpa [#allocation4 + $0x1], 1 }
 0x480   :  { %2547 = vsyncpa [#allocation6], 1 }
 0x481   :  { %2548 = vsyncpa [#allocation9], 1 }

</bundles_post_ra>
